<compile_context>
chip_gen: v7x
topology: tpu7x:2x2x1
jax: 0.10.0
libtpu: 0.0.40
codegen_flags: <defaults>
</compile_context>

<pallas_src>
import functools
import math

import jax
import jax.numpy as jnp
from jax.experimental import pallas as pl
from jax.experimental.pallas import tpu as pltpu

LANE = 128  # lane width / MXU-friendly padding unit


def _round_up(x, m):
    return (x + m - 1) // m * m


def _nbytes(a):
    return int(a.size) * jnp.dtype(a.dtype).itemsize


@functools.lru_cache(maxsize=None)
def _vmem_budget_bytes():
    """Per-generation VMEM budget (70% of capacity, capped) used for tile selection
    and as the explicit scoped-VMEM limit of every pallas_call."""
    cap = 64 * 1024 * 1024  # conservative default (v7x per-TC VMEM)
    try:
        info = pltpu.get_tpu_info()
        cap = int(getattr(info, "vmem_capacity_bytes", cap) or cap)
    except Exception:
        pass
    return min(int(cap * 0.7), 96 * 1024 * 1024)


@functools.lru_cache(maxsize=None)
def _single_buffer_supported():
    """Probe once whether pipeline_mode=pl.Buffered(1) compiles & runs here."""
    try:
        def _k(x_ref, o_ref):
            o_ref[...] = x_ref[...]
        out = pl.pallas_call(
            _k,
            out_shape=jax.ShapeDtypeStruct((8, 128), jnp.float32),
            grid=(1,),
            in_specs=[pl.BlockSpec((8, 128), lambda i: (0, 0),
                                   pipeline_mode=pl.Buffered(1))],
            out_specs=pl.BlockSpec((8, 128), lambda i: (0, 0)),
        )(jnp.zeros((8, 128), jnp.float32))
        jax.block_until_ready(out)
        return True
    except Exception:
        return False


def _resident_spec(shape, index_map):
    """Constant-index (VMEM-resident) block: single-buffer it when supported."""
    if _single_buffer_supported():
        return pl.BlockSpec(shape, index_map, pipeline_mode=pl.Buffered(1))
    return pl.BlockSpec(shape, index_map)


# --------------------------------------------------------------------------------------
# Fused, weight-resident MLP kernel.
#   act = cat(x_slabs, -1)            (never materialized: layer 0 is a block-sum)
#   for l: act = [relu](act @ W_l + b_l)     bf16 MXU matmul, f32 accumulation
# --------------------------------------------------------------------------------------
def _mlp_kernel(*refs, n_in, nlayers, relu, in_widths):
    x_refs = refs[:n_in]
    o_ref = refs[n_in + 2 * nlayers]

    # Layer 0: sum_b slab_b @ W0[row-block b]  (fused concat).
    w0_ref = refs[n_in]
    b0_ref = refs[n_in + 1]
    acc = None
    off = 0
    for b in range(n_in):
        xb = x_refs[b][...]
        if xb.dtype != jnp.bfloat16:
            xb = xb.astype(jnp.bfloat16)
        part = jnp.dot(xb, w0_ref[off:off + in_widths[b], :],
                       preferred_element_type=jnp.float32)
        acc = part if acc is None else acc + part
        off += in_widths[b]
    y = acc + b0_ref[...]                       # f32 epilogue (v5e-safe)
    if relu:
        y = jnp.maximum(y, 0.0)

    for l in range(1, nlayers):                 # static unroll (L is small)
        act = y.astype(jnp.bfloat16)
        w_ref = refs[n_in + 2 * l]
        b_ref = refs[n_in + 2 * l + 1]
        y = jnp.dot(act, w_ref[...], preferred_element_type=jnp.float32) + b_ref[...]
        if relu:
            y = jnp.maximum(y, 0.0)

    o_ref[...] = y.astype(o_ref.dtype)


def fused_mlp(x_list, layers, *, relu, out_dtype=jnp.bfloat16):
    """x_list: pre-padded bf16 slabs [mp, k_b]; layers: [(W_p [K,N] bf16, b_p [1,N] f32)].

    Layer 0's weight K equals sum of slab widths and is stored in matching row blocks,
    so the concat never hits HBM.  Weights/biases use a constant block index (DMA'd
    once, single-buffered, VMEM-resident across the row grid); only the input slabs
    and the output stream HBM.  Row tile is VMEM-budget aware.
    TODO(synk): K/N-tiled fallback for hidden sizes whose resident weights exceed the
    budget; second 'parallel' axis for the 2nd v7x TensorCore when the row grid is short.
    """
    mp = int(x_list[0].shape[0])
    in_widths = tuple(int(x.shape[1]) for x in x_list)
    k_total = sum(in_widths)
    assert mp % 8 == 0 and all(w % LANE == 0 for w in in_widths)
    assert int(layers[0][0].shape[0]) == k_total
    n_out = int(layers[-1][0].shape[1])
    max_np = max(int(w.shape[1]) for w, _ in layers)
    out_itemsize = jnp.dtype(out_dtype).itemsize

    budget = _vmem_budget_bytes()
    resident = sum(_nbytes(w) + _nbytes(b) for w, b in layers)
    if not _single_buffer_supported():
        resident *= 2
    per_row = 2 * k_total * 2 + 2 * n_out * out_itemsize + 4 * max_np * 4
    tm = 128
    for cand in (512, 256, 128):
        if mp % cand == 0 and resident + cand * per_row <= budget:
            tm = cand
            break

    in_specs = [pl.BlockSpec((tm, w_), lambda i: (i, 0)) for w_ in in_widths]
    args = list(x_list)
    for (w, b) in layers:
        kp, np_ = int(w.shape[0]), int(w.shape[1])
        in_specs.append(_resident_spec((kp, np_), lambda i: (0, 0)))
        in_specs.append(_resident_spec((1, np_), lambda i: (0, 0)))
        args += [w, b]

    flops = 2 * mp * sum(int(w.shape[0]) * int(w.shape[1]) for w, _ in layers)
    bytes_accessed = sum(_nbytes(a) for a in args) + mp * n_out * out_itemsize

    kernel = functools.partial(_mlp_kernel, n_in=len(x_list), nlayers=len(layers),
                               relu=relu, in_widths=in_widths)
    return pl.pallas_call(
        kernel,
        out_shape=jax.ShapeDtypeStruct((mp, n_out), out_dtype),
        grid_spec=pltpu.PrefetchScalarGridSpec(
            num_scalar_prefetch=0,
            grid=(mp // tm,),
            in_specs=in_specs,
            out_specs=pl.BlockSpec((tm, n_out), lambda i: (i, 0)),
        ),
        compiler_params=pltpu.CompilerParams(
            dimension_semantics=("parallel",),
            vmem_limit_bytes=int(budget)),
        cost_estimate=pl.CostEstimate(flops=int(flops), transcendentals=0,
                                      bytes_accessed=int(bytes_accessed)),
    )(*args)


# --------------------------------------------------------------------------------------
# K-tiled dense adjacency matmul with shared-A multi-RHS:  [A @ X_r for X_r in x_list]
# (gather + scatter_add('add') over the edge list == adjacency matmul)
# --------------------------------------------------------------------------------------
def _adj_kernel(*refs, n_rhs):
    a_ref = refs[0]
    x_refs = refs[1:1 + n_rhs]
    out_refs = refs[1 + n_rhs:1 + 2 * n_rhs]
    acc_refs = refs[1 + 2 * n_rhs:]
    k = pl.program_id(1)

    @pl.when(k == 0)
    def _():
        for acc in acc_refs:
            acc[...] = jnp.zeros_like(acc)

    a = a_ref[...]
    for r in range(n_rhs):
        acc_refs[r][...] += jnp.dot(a, x_refs[r][...],
                                    preferred_element_type=jnp.float32)

    @pl.when(k == pl.num_programs(1) - 1)
    def _():
        for r in range(n_rhs):
            out_refs[r][...] = acc_refs[r][...].astype(out_refs[r].dtype)


def adjacency_matmul(a_bf16, x_list, out_dtype=jnp.bfloat16):
    """Stream A once, produce A @ X_r for every RHS (f32 VMEM accumulators, K-tiled).

    TODO(synk): sparse (scalar-prefetch gather + segment-sum) path and per-row-tile
    nnz skipping so large sparse graphs don't pay O(M*K*D) dense flops.
    """
    m, kdim = (int(s) for s in a_bf16.shape)
    dps = [int(x.shape[1]) for x in x_list]
    assert all(int(x.shape[0]) == kdim for x in x_list)
    n_rhs = len(x_list)
    out_itemsize = jnp.dtype(out_dtype).itemsize
    budget = _vmem_budget_bytes()

    tk = next((t for t in (512, 256, 128) if kdim % t == 0), 128)
    x_tiles = sum(2 * tk * d * 2 for d in dps)          # double-buffered X tiles
    tm = 128
    for cand in (512, 256, 128):
        if m % cand != 0:
            continue
        need = (2 * cand * tk * 2 + x_tiles
                + sum(cand * d * 4 for d in dps)                  # f32 accumulators
                + sum(2 * cand * d * out_itemsize for d in dps))  # outputs
        if need <= budget:
            tm = cand
            break

    in_specs = [pl.BlockSpec((tm, tk), lambda i, k: (i, k))]
    in_specs += [pl.BlockSpec((tk, d), lambda i, k: (k, 0)) for d in dps]
    out_specs = [pl.BlockSpec((tm, d), lambda i, k: (i, 0)) for d in dps]
    out_shape = tuple(jax.ShapeDtypeStruct((m, d), out_dtype) for d in dps)
    scratch = [pltpu.VMEM((tm, d), jnp.float32) for d in dps]

    flops = 2 * m * kdim * sum(dps)
    bytes_accessed = (_nbytes(a_bf16) + sum(_nbytes(x) for x in x_list)
                      + sum(m * d * out_itemsize for d in dps))

    return pl.pallas_call(
        functools.partial(_adj_kernel, n_rhs=n_rhs),
        out_shape=out_shape,
        grid_spec=pltpu.PrefetchScalarGridSpec(
            num_scalar_prefetch=0,
            grid=(m // tm, kdim // tk),
            in_specs=in_specs,
            out_specs=out_specs,
            scratch_shapes=scratch,
        ),
        compiler_params=pltpu.CompilerParams(
            dimension_semantics=("parallel", "arbitrary"),
            vmem_limit_bytes=int(budget)),
        cost_estimate=pl.CostEstimate(flops=int(flops), transcendentals=0,
                                      bytes_accessed=int(bytes_accessed)),
    )(a_bf16, *x_list)


# --------------------------------------------------------------------------------------
# Parameter init: PyTorch-style uniform Linear, eval-mode BN folded into W/b, padded
# to lane-aligned bf16 once.
# --------------------------------------------------------------------------------------
def init_linear_bn(key, din, dout, eps=1e-5):
    kw, kb = jax.random.split(key)
    bound = 1.0 / float(din) ** 0.5
    W = jax.random.uniform(kw, (din, dout), jnp.float32, -bound, bound)
    b = jax.random.uniform(kb, (dout,), jnp.float32, -bound, bound)
    # BN eval mode (gamma=1, beta=0, mean=0, var=1): scale = 1/sqrt(1+eps), shift = 0.
    # TODO(synk): general fold (gamma/sqrt(var+eps), beta - mean*scale) for checkpoints.
    scale = 1.0 / (1.0 + eps) ** 0.5
    return W * scale, b * scale


def _pad_wb(W, b):
    din, dout = W.shape
    kp, np_ = _round_up(din, LANE), _round_up(dout, LANE)
    W_p = jnp.zeros((kp, np_), jnp.bfloat16).at[:din, :dout].set(W.astype(jnp.bfloat16))
    b_p = jnp.zeros((1, np_), jnp.float32).at[0, :dout].set(b)
    return W_p, b_p


def init_mlp(key, din, dout, num_layers):
    keys = jax.random.split(key, num_layers)
    layers, d = [], din
    for i in range(num_layers):
        layers.append(_pad_wb(*init_linear_bn(keys[i], d, dout)))
        d = dout
    return layers


def init_nn_out(key, nhid, num_layers, dh_p):
    """nn_out's first layer consumes cat([x, right, left, right_left], -1); the weight
    is stored in 4 row blocks of stride dh_p so the kernel can consume the 4 slabs
    directly (block-sum) without materializing the concat."""
    keys = jax.random.split(key, num_layers)
    h = nhid // 2
    np_out = _round_up(nhid, LANE)

    W0, b0 = init_linear_bn(keys[0], 2 * nhid, nhid)
    W0p = jnp.zeros((4 * dh_p, np_out), jnp.bfloat16)
    for blk in range(4):
        W0p = W0p.at[blk * dh_p:blk * dh_p + h, :nhid].set(
            W0[blk * h:(blk + 1) * h].astype(jnp.bfloat16))
    b0p = jnp.zeros((1, np_out), jnp.float32).at[0, :nhid].set(b0)

    layers = [(W0p, b0p)]
    for i in range(1, num_layers):
        layers.append(_pad_wb(*init_linear_bn(keys[i], nhid, nhid)))
    return layers


def init_parallel_layer(key, nhid, mlp_num_layers=2, pools=("add",)):
    npool = len(pools)
    ks = jax.random.split(key, 7)
    dh_p = _round_up(nhid // 2, LANE)
    return dict(
        nn1=init_mlp(ks[0], nhid, nhid, mlp_num_layers),
        nn2=init_mlp(ks[1], npool * nhid, nhid, mlp_num_layers),
        linear1=_pad_wb(*init_linear_bn(ks[2], nhid, nhid // 2)),
        linear2=_pad_wb(*init_linear_bn(ks[3], npool * nhid, nhid // 2)),
        linear3=_pad_wb(*init_linear_bn(ks[4], npool * nhid, nhid // 2)),
        linear4=_pad_wb(*init_linear_bn(ks[5], npool * nhid, nhid // 2)),
        nn_out=init_nn_out(ks[6], nhid, mlp_num_layers, dh_p),
    )


# --------------------------------------------------------------------------------------
# ParallelLayer.forward  (pools=['add'])
# --------------------------------------------------------------------------------------
def parallel_layer_forward(params, combined_xs, combined_batch, combined_bipartities,
                           *, n_left, n_right):
    N, nhid = combined_xs.shape
    dp = _round_up(nhid, LANE)
    np_rows = _round_up(N, LANE)
    nl_p = _round_up(n_left, LANE)
    nr_p = _round_up(n_right, LANE)

    last = combined_batch.max()                        # traced (no host sync)
    mask_left = combined_batch != last                 # x_left  = xs[batch != last]
    mask_right = combined_batch != 0                   # x_right = xs[batch != 0]
    # NOTE: n_left / n_right must equal the true mask counts, otherwise nonzero's fill
    # would alias row 0 in the gathers / row-assignments below.
    idx_left = jnp.nonzero(mask_left, size=n_left)[0].astype(jnp.int32)
    idx_right = jnp.nonzero(mask_right, size=n_right)[0].astype(jnp.int32)
    idx_left_p = jnp.zeros((nl_p,), jnp.int32).at[:n_left].set(idx_left)
    idx_right_p = jnp.zeros((nr_p,), jnp.int32).at[:n_right].set(idx_right)

    # Pad/cast activations ONCE; everything below stays tile-aligned bf16.
    x_p = jnp.zeros((np_rows, dp), jnp.bfloat16).at[:N, :nhid].set(
        combined_xs.astype(jnp.bfloat16))

    # Dense adjacency built directly in bf16 from the edge list (exact for counts<=256).
    src_l, src_r = combined_bipartities[0], combined_bipartities[1]
    one = jnp.ones(src_l.shape, jnp.bfloat16)
    A_lr = jnp.zeros((nl_p, nr_p), jnp.bfloat16).at[src_l, src_r].add(one)
    A_rl = jnp.zeros((nr_p, nl_p), jnp.bfloat16).at[src_r, src_l].add(one)

    # TODO(synk): fold these XLA-side gathers into the Pallas calls (scalar-prefetch
    # row index maps) to remove the extra [n, dp] HBM round trips.
    x_right_p = x_p[idx_right_p]                                      # [nr_p, dp]

    # right_info = scatter_add(x_right[bip1], bip0, n_left) == A_lr @ x_right
    (right_info,) = adjacency_matmul(A_lr, [x_right_p])               # [nl_p, dp]

    x_all_new = fused_mlp([x_p], params["nn1"], relu=True)            # [np_rows, dp]
    x_left_new_p = x_all_new[idx_left_p]                              # [nl_p, dp]

    right_info_new = fused_mlp([right_info], params["nn2"], relu=True)  # [nl_p, dp]

    # Both A_rl products share ONE streamed pass over A_rl.
    left_info, right_left_info = adjacency_matmul(
        A_rl, [x_left_new_p, right_info_new])                         # 2 x [nr_p, dp]

    # Four Linear->BN->ReLU heads (single-layer fused calls, lane-padded outputs).
    x_head = fused_mlp([x_p], [params["linear1"]], relu=True)                # [np_rows, dh_p]
    right_tmp = fused_mlp([right_info], [params["linear2"]], relu=True)      # [nl_p, dh_p]
    left_tmp = fused_mlp([left_info], [params["linear3"]], relu=True)        # [nr_p, dh_p]
    rl_tmp = fused_mlp([right_left_info], [params["linear4"]], relu=True)    # [nr_p, dh_p]

    # Masked row assignment onto a clone of x_head (matches torch.clone(x) + mask set).
    right_full = x_head.at[idx_left].set(right_tmp[:n_left])
    left_full = x_head.at[idx_right].set(left_tmp[:n_right])
    rl_full = x_head.at[idx_right].set(rl_tmp[:n_right])

    # nn_out consumes the 4 slabs directly (block-sum first layer); no HBM concat.
    out_p = fused_mlp([x_head, right_full, left_full, rl_full],
                      params["nn_out"], relu=True, out_dtype=jnp.float32)
    return out_p[:N, :nhid]                            # single un-pad at the very end


# --------------------------------------------------------------------------------------
if __name__ == "__main__":
    # Warm the runtime probes outside the jit trace.
    _vmem_budget_bytes()
    _single_buffer_supported()

    key = jax.random.PRNGKey(0)
    nhid = 32
    sizes = (4, 5, 3)  # nodes per batch id 0, 1, 2
    combined_batch = jnp.concatenate(
        [jnp.full((s,), i, jnp.int32) for i, s in enumerate(sizes)])
    N = int(combined_batch.shape[0])          # 12
    n_left = sum(sizes[:-1])                  # batch != last -> 9
    n_right = sum(sizes[1:])                  # batch != 0    -> 8

    k1, k2, k3, kp = jax.random.split(key, 4)
    combined_xs = jax.random.normal(k1, (N, nhid), jnp.float32)
    E = 10
    bip0 = jax.random.randint(k2, (E,), 0, n_left)    # indices into x_left
    bip1 = jax.random.randint(k3, (E,), 0, n_right)   # indices into x_right
    combined_bipartities = jnp.stack([bip0, bip1])

    params = init_parallel_layer(kp, nhid, mlp_num_layers=2, pools=("add",))

    fwd = jax.jit(parallel_layer_forward, static_argnames=("n_left", "n_right"))
    out = fwd(params, combined_xs, combined_batch, combined_bipartities,
              n_left=n_left, n_right=n_right)
    jax.block_until_ready(out)
    assert out.shape == (N, nhid) and out.dtype == jnp.float32
    assert bool(jnp.all(jnp.isfinite(out)))
    print("KERNEL_OK")
</pallas_src>

<mosaic_0001>
module attributes {stable_mosaic.version = 11 : i64} {
  func.func @_k(%arg0: i32, %arg1: memref<8x128xf32, #tpu.memory_space<vmem>>, %arg2: memref<8x128xf32, #tpu.memory_space<vmem>>) attributes {dimension_semantics = [#tpu.dimension_semantics<arbitrary>], iteration_bounds = array<i64: 1>, scalar_prefetch = 0 : i64, scratch_operands = 0 : i64, tpu.core_type = #tpu.core_type<tc>, window_params = [{pipeline_mode = #tpu.pipeline_mode<synchronous>, transform_indices = @transform_0, window_bounds = array<i64: 8, 128>}, {pipeline_mode = #tpu.pipeline_mode<synchronous>, transform_indices = @transform_1, window_bounds = array<i64: 8, 128>}]} {
    %c0 = arith.constant 0 : index
    %c0_0 = arith.constant 0 : index
    %0 = vector.load %arg1[%c0, %c0_0] : memref<8x128xf32, #tpu.memory_space<vmem>>, vector<8x128xf32>
    %c0_1 = arith.constant 0 : index
    %c0_2 = arith.constant 0 : index
    %1 = vector.load %arg2[%c0_1, %c0_2] : memref<8x128xf32, #tpu.memory_space<vmem>>, vector<8x128xf32>
    tpu.vector_store %arg2[%c0_1, %c0_2], %0 {strides = array<i32>} : memref<8x128xf32, #tpu.memory_space<vmem>>, vector<8x128xf32>,
    return
  }
  func.func @transform_0(%arg0: i32) -> (i32, i32) {
    %c0_i32 = arith.constant 0 : i32
    %c0_i32_0 = arith.constant 0 : i32
    %c0_i32_1 = arith.constant 0 : i32
    return %c0_i32, %c0_i32_0 : i32, i32
  }
  func.func @transform_1(%arg0: i32) -> (i32, i32) {
    %c0_i32 = arith.constant 0 : i32
    %c0_i32_0 = arith.constant 0 : i32
    %c0_i32_1 = arith.constant 0 : i32
    return %c0_i32, %c0_i32_0 : i32, i32
  }
}

module attributes {stable_mosaic.version = 11 : i64} {
  func.func @_adj_kernel(%arg0: i32, %arg1: i32, %arg2: memref<128x128xbf16, #tpu.memory_space<vmem>>, %arg3: memref<128x128xbf16, #tpu.memory_space<vmem>>, %arg4: memref<128x128xbf16, #tpu.memory_space<vmem>>, %arg5: memref<128x128xf32, #tpu.memory_space<vmem>>) attributes {dimension_semantics = [#tpu.dimension_semantics<parallel>, #tpu.dimension_semantics<arbitrary>], iteration_bounds = array<i64: 1, 1>, scalar_prefetch = 0 : i64, scratch_operands = 1 : i64, tpu.core_type = #tpu.core_type<tc>, window_params = [{transform_indices = @transform_0, window_bounds = array<i64: 128, 128>}, {transform_indices = @transform_1, window_bounds = array<i64: 128, 128>}, {transform_indices = @transform_2, window_bounds = array<i64: 128, 128>}]} {
    %c0_i32 = arith.constant 0 : i32
    %0 = arith.cmpi eq, %arg1, %c0_i32 : i32
    %1 = arith.extui %0 : i1 to i32
    %c0_i32_0 = arith.constant 0 : i32
    %2 = arith.cmpi ne, %1, %c0_i32_0 : i32
    scf.if %2 {
      %cst_10 = arith.constant 0.000000e+00 : f32
      %12 = vector.broadcast %cst_10 : f32 to vector<128x128xf32>
      %c0_11 = arith.constant 0 : index
      %c0_12 = arith.constant 0 : index
      %13 = vector.load %arg5[%c0_11, %c0_12] : memref<128x128xf32, #tpu.memory_space<vmem>>, vector<128x128xf32>
      tpu.vector_store %arg5[%c0_11, %c0_12], %12 {strides = array<i32>} : memref<128x128xf32, #tpu.memory_space<vmem>>, vector<128x128xf32>,
    } else {
    }
    %c0 = arith.constant 0 : index
    %c0_1 = arith.constant 0 : index
    %3 = vector.load %arg2[%c0, %c0_1] : memref<128x128xbf16, #tpu.memory_space<vmem>>, vector<128x128xbf16>
    %c0_2 = arith.constant 0 : index
    %c0_3 = arith.constant 0 : index
    %4 = vector.load %arg5[%c0_2, %c0_3] : memref<128x128xf32, #tpu.memory_space<vmem>>, vector<128x128xf32>
    %c0_4 = arith.constant 0 : index
    %c0_5 = arith.constant 0 : index
    %5 = vector.load %arg3[%c0_4, %c0_5] : memref<128x128xbf16, #tpu.memory_space<vmem>>, vector<128x128xbf16>
    %cst = arith.constant dense<0.000000e+00> : vector<128x128xf32>
    %6 = tpu.matmul %3, %5, %cst {dimension_numbers = #tpu.dot_dimension_numbers<[1], [0], [0], [1], [0, 0, 1, 1], [], []>} : vector<128x128xbf16>, vector<128x128xbf16>, vector<128x128xf32> -> vector<128x128xf32>
    %7 = arith.addf %4, %6 : vector<128x128xf32>
    %c0_6 = arith.constant 0 : index
    %c0_7 = arith.constant 0 : index
    %8 = vector.load %arg5[%c0_6, %c0_7] : memref<128x128xf32, #tpu.memory_space<vmem>>, vector<128x128xf32>
    tpu.vector_store %arg5[%c0_6, %c0_7], %7 {strides = array<i32>} : memref<128x128xf32, #tpu.memory_space<vmem>>, vector<128x128xf32>,
    %c0_i32_8 = arith.constant 0 : i32
    %9 = arith.cmpi eq, %arg1, %c0_i32_8 : i32
    %10 = arith.extui %9 : i1 to i32
    %c0_i32_9 = arith.constant 0 : i32
    %11 = arith.cmpi ne, %10, %c0_i32_9 : i32
    scf.if %11 {
      %c0_10 = arith.constant 0 : index
      %c0_11 = arith.constant 0 : index
      %12 = vector.load %arg5[%c0_10, %c0_11] : memref<128x128xf32, #tpu.memory_space<vmem>>, vector<128x128xf32>
      %13 = arith.truncf %12 : vector<128x128xf32> to vector<128x128xbf16>
      %c0_12 = arith.constant 0 : index
      %c0_13 = arith.constant 0 : index
      %14 = vector.load %arg4[%c0_12, %c0_13] : memref<128x128xbf16, #tpu.memory_space<vmem>>, vector<128x128xbf16>
      tpu.vector_store %arg4[%c0_12, %c0_13], %13 {strides = array<i32>} : memref<128x128xbf16, #tpu.memory_space<vmem>>, vector<128x128xbf16>,
    } else {
    }
    return
  }
  func.func @transform_0(%arg0: i32, %arg1: i32) -> (i32, i32) {
    %c0_i32 = arith.constant 0 : i32
    return %arg0, %arg1 : i32, i32
  }
  func.func @transform_1(%arg0: i32, %arg1: i32) -> (i32, i32) {
    %c0_i32 = arith.constant 0 : i32
    %c0_i32_0 = arith.constant 0 : i32
    return %arg1, %c0_i32 : i32, i32
  }
  func.func @transform_2(%arg0: i32, %arg1: i32) -> (i32, i32) {
    %c0_i32 = arith.constant 0 : i32
    %c0_i32_0 = arith.constant 0 : i32
    return %arg0, %c0_i32 : i32, i32
  }
}

module attributes {stable_mosaic.version = 11 : i64} {
  func.func @_mlp_kernel(%arg0: i32, %arg1: memref<128x128xbf16, #tpu.memory_space<vmem>>, %arg2: memref<128x128xbf16, #tpu.memory_space<vmem>>, %arg3: memref<1x128xf32, #tpu.memory_space<vmem>>, %arg4: memref<128x128xbf16, #tpu.memory_space<vmem>>, %arg5: memref<1x128xf32, #tpu.memory_space<vmem>>, %arg6: memref<128x128xbf16, #tpu.memory_space<vmem>>) attributes {dimension_semantics = [#tpu.dimension_semantics<parallel>], iteration_bounds = array<i64: 1>, scalar_prefetch = 0 : i64, scratch_operands = 0 : i64, tpu.core_type = #tpu.core_type<tc>, window_params = [{transform_indices = @transform_0, window_bounds = array<i64: 128, 128>}, {pipeline_mode = #tpu.pipeline_mode<synchronous>, transform_indices = @transform_1, window_bounds = array<i64: 128, 128>}, {pipeline_mode = #tpu.pipeline_mode<synchronous>, transform_indices = @transform_2, window_bounds = array<i64: 1, 128>}, {pipeline_mode = #tpu.pipeline_mode<synchronous>, transform_indices = @transform_3, window_bounds = array<i64: 128, 128>}, {pipeline_mode = #tpu.pipeline_mode<synchronous>, transform_indices = @transform_4, window_bounds = array<i64: 1, 128>}, {transform_indices = @transform_5, window_bounds = array<i64: 128, 128>}]} {
    %c0 = arith.constant 0 : index
    %c0_0 = arith.constant 0 : index
    %0 = vector.load %arg1[%c0, %c0_0] : memref<128x128xbf16, #tpu.memory_space<vmem>>, vector<128x128xbf16>
    %c0_1 = arith.constant 0 : index
    %c0_2 = arith.constant 0 : index
    %1 = vector.load %arg2[%c0_1, %c0_2] : memref<128x128xbf16, #tpu.memory_space<vmem>>, vector<128x128xbf16>
    %cst = arith.constant dense<0.000000e+00> : vector<128x128xf32>
    %2 = tpu.matmul %0, %1, %cst {dimension_numbers = #tpu.dot_dimension_numbers<[1], [0], [0], [1], [0, 0, 1, 1], [], []>} : vector<128x128xbf16>, vector<128x128xbf16>, vector<128x128xf32> -> vector<128x128xf32>
    %c0_3 = arith.constant 0 : index
    %c0_4 = arith.constant 0 : index
    %3 = vector.load %arg3[%c0_3, %c0_4] : memref<1x128xf32, #tpu.memory_space<vmem>>, vector<1x128xf32>
    %4 = vector.broadcast %3 : vector<1x128xf32> to vector<128x128xf32>
    %5 = arith.addf %2, %4 : vector<128x128xf32>
    %cst_5 = arith.constant 0.000000e+00 : f32
    %6 = vector.broadcast %cst_5 : f32 to vector<128x128xf32>
    %7 = arith.maximumf %5, %6 : vector<128x128xf32>
    %8 = arith.truncf %7 : vector<128x128xf32> to vector<128x128xbf16>
    %c0_6 = arith.constant 0 : index
    %c0_7 = arith.constant 0 : index
    %9 = vector.load %arg4[%c0_6, %c0_7] : memref<128x128xbf16, #tpu.memory_space<vmem>>, vector<128x128xbf16>
    %cst_8 = arith.constant dense<0.000000e+00> : vector<128x128xf32>
    %10 = tpu.matmul %8, %9, %cst_8 {dimension_numbers = #tpu.dot_dimension_numbers<[1], [0], [0], [1], [0, 0, 1, 1], [], []>} : vector<128x128xbf16>, vector<128x128xbf16>, vector<128x128xf32> -> vector<128x128xf32>
    %c0_9 = arith.constant 0 : index
    %c0_10 = arith.constant 0 : index
    %11 = vector.load %arg5[%c0_9, %c0_10] : memref<1x128xf32, #tpu.memory_space<vmem>>, vector<1x128xf32>
    %12 = vector.broadcast %11 : vector<1x128xf32> to vector<128x128xf32>
    %13 = arith.addf %10, %12 : vector<128x128xf32>
    %cst_11 = arith.constant 0.000000e+00 : f32
    %14 = vector.broadcast %cst_11 : f32 to vector<128x128xf32>
    %15 = arith.maximumf %13, %14 : vector<128x128xf32>
    %16 = arith.truncf %15 : vector<128x128xf32> to vector<128x128xbf16>
    %c0_12 = arith.constant 0 : index
    %c0_13 = arith.constant 0 : index
    %17 = vector.load %arg6[%c0_12, %c0_13] : memref<128x128xbf16, #tpu.memory_space<vmem>>, vector<128x128xbf16>
    tpu.vector_store %arg6[%c0_12, %c0_13], %16 {strides = array<i32>} : memref<128x128xbf16, #tpu.memory_space<vmem>>, vector<128x128xbf16>,
    return
  }
  func.func @transform_0(%arg0: i32) -> (i32, i32) {
    %c0_i32 = arith.constant 0 : i32
    %c0_i32_0 = arith.constant 0 : i32
    return %arg0, %c0_i32 : i32, i32
  }
  func.func @transform_1(%arg0: i32) -> (i32, i32) {
    %c0_i32 = arith.constant 0 : i32
    %c0_i32_0 = arith.constant 0 : i32
    %c0_i32_1 = arith.constant 0 : i32
    return %c0_i32, %c0_i32_0 : i32, i32
  }
  func.func @transform_2(%arg0: i32) -> (i32, i32) {
    %c0_i32 = arith.constant 0 : i32
    %c0_i32_0 = arith.constant 0 : i32
    %c0_i32_1 = arith.constant 0 : i32
    return %c0_i32, %c0_i32_0 : i32, i32
  }
  func.func @transform_3(%arg0: i32) -> (i32, i32) {
    %c0_i32 = arith.constant 0 : i32
    %c0_i32_0 = arith.constant 0 : i32
    %c0_i32_1 = arith.constant 0 : i32
    return %c0_i32, %c0_i32_0 : i32, i32
  }
  func.func @transform_4(%arg0: i32) -> (i32, i32) {
    %c0_i32 = arith.constant 0 : i32
    %c0_i32_0 = arith.constant 0 : i32
    %c0_i32_1 = arith.constant 0 : i32
    return %c0_i32, %c0_i32_0 : i32, i32
  }
  func.func @transform_5(%arg0: i32) -> (i32, i32) {
    %c0_i32 = arith.constant 0 : i32
    %c0_i32_0 = arith.constant 0 : i32
    return %arg0, %c0_i32 : i32, i32
  }
}

module attributes {stable_mosaic.version = 11 : i64} {
  func.func @_mlp_kernel(%arg0: i32, %arg1: memref<128x128xbf16, #tpu.memory_space<vmem>>, %arg2: memref<128x128xbf16, #tpu.memory_space<vmem>>, %arg3: memref<1x128xf32, #tpu.memory_space<vmem>>, %arg4: memref<128x128xbf16, #tpu.memory_space<vmem>>) attributes {dimension_semantics = [#tpu.dimension_semantics<parallel>], iteration_bounds = array<i64: 1>, scalar_prefetch = 0 : i64, scratch_operands = 0 : i64, tpu.core_type = #tpu.core_type<tc>, window_params = [{transform_indices = @transform_0, window_bounds = array<i64: 128, 128>}, {pipeline_mode = #tpu.pipeline_mode<synchronous>, transform_indices = @transform_1, window_bounds = array<i64: 128, 128>}, {pipeline_mode = #tpu.pipeline_mode<synchronous>, transform_indices = @transform_2, window_bounds = array<i64: 1, 128>}, {transform_indices = @transform_3, window_bounds = array<i64: 128, 128>}]} {
    %c0 = arith.constant 0 : index
    %c0_0 = arith.constant 0 : index
    %0 = vector.load %arg1[%c0, %c0_0] : memref<128x128xbf16, #tpu.memory_space<vmem>>, vector<128x128xbf16>
    %c0_1 = arith.constant 0 : index
    %c0_2 = arith.constant 0 : index
    %1 = vector.load %arg2[%c0_1, %c0_2] : memref<128x128xbf16, #tpu.memory_space<vmem>>, vector<128x128xbf16>
    %cst = arith.constant dense<0.000000e+00> : vector<128x128xf32>
    %2 = tpu.matmul %0, %1, %cst {dimension_numbers = #tpu.dot_dimension_numbers<[1], [0], [0], [1], [0, 0, 1, 1], [], []>} : vector<128x128xbf16>, vector<128x128xbf16>, vector<128x128xf32> -> vector<128x128xf32>
    %c0_3 = arith.constant 0 : index
    %c0_4 = arith.constant 0 : index
    %3 = vector.load %arg3[%c0_3, %c0_4] : memref<1x128xf32, #tpu.memory_space<vmem>>, vector<1x128xf32>
    %4 = vector.broadcast %3 : vector<1x128xf32> to vector<128x128xf32>
    %5 = arith.addf %2, %4 : vector<128x128xf32>
    %cst_5 = arith.constant 0.000000e+00 : f32
    %6 = vector.broadcast %cst_5 : f32 to vector<128x128xf32>
    %7 = arith.maximumf %5, %6 : vector<128x128xf32>
    %8 = arith.truncf %7 : vector<128x128xf32> to vector<128x128xbf16>
    %c0_6 = arith.constant 0 : index
    %c0_7 = arith.constant 0 : index
    %9 = vector.load %arg4[%c0_6, %c0_7] : memref<128x128xbf16, #tpu.memory_space<vmem>>, vector<128x128xbf16>
    tpu.vector_store %arg4[%c0_6, %c0_7], %8 {strides = array<i32>} : memref<128x128xbf16, #tpu.memory_space<vmem>>, vector<128x128xbf16>,
    return
  }
  func.func @transform_0(%arg0: i32) -> (i32, i32) {
    %c0_i32 = arith.constant 0 : i32
    %c0_i32_0 = arith.constant 0 : i32
    return %arg0, %c0_i32 : i32, i32
  }
  func.func @transform_1(%arg0: i32) -> (i32, i32) {
    %c0_i32 = arith.constant 0 : i32
    %c0_i32_0 = arith.constant 0 : i32
    %c0_i32_1 = arith.constant 0 : i32
    return %c0_i32, %c0_i32_0 : i32, i32
  }
  func.func @transform_2(%arg0: i32) -> (i32, i32) {
    %c0_i32 = arith.constant 0 : i32
    %c0_i32_0 = arith.constant 0 : i32
    %c0_i32_1 = arith.constant 0 : i32
    return %c0_i32, %c0_i32_0 : i32, i32
  }
  func.func @transform_3(%arg0: i32) -> (i32, i32) {
    %c0_i32 = arith.constant 0 : i32
    %c0_i32_0 = arith.constant 0 : i32
    return %arg0, %c0_i32 : i32, i32
  }
}

module attributes {stable_mosaic.version = 11 : i64} {
  func.func @_adj_kernel(%arg0: i32, %arg1: i32, %arg2: memref<128x128xbf16, #tpu.memory_space<vmem>>, %arg3: memref<128x128xbf16, #tpu.memory_space<vmem>>, %arg4: memref<128x128xbf16, #tpu.memory_space<vmem>>, %arg5: memref<128x128xbf16, #tpu.memory_space<vmem>>, %arg6: memref<128x128xbf16, #tpu.memory_space<vmem>>, %arg7: memref<128x128xf32, #tpu.memory_space<vmem>>, %arg8: memref<128x128xf32, #tpu.memory_space<vmem>>) attributes {dimension_semantics = [#tpu.dimension_semantics<parallel>, #tpu.dimension_semantics<arbitrary>], iteration_bounds = array<i64: 1, 1>, scalar_prefetch = 0 : i64, scratch_operands = 2 : i64, tpu.core_type = #tpu.core_type<tc>, window_params = [{transform_indices = @transform_0, window_bounds = array<i64: 128, 128>}, {transform_indices = @transform_1, window_bounds = array<i64: 128, 128>}, {transform_indices = @transform_2, window_bounds = array<i64: 128, 128>}, {transform_indices = @transform_3, window_bounds = array<i64: 128, 128>}, {transform_indices = @transform_4, window_bounds = array<i64: 128, 128>}]} {
    %c0_i32 = arith.constant 0 : i32
    %0 = arith.cmpi eq, %arg1, %c0_i32 : i32
    %1 = arith.extui %0 : i1 to i32
    %c0_i32_0 = arith.constant 0 : i32
    %2 = arith.cmpi ne, %1, %c0_i32_0 : i32
    scf.if %2 {
      %cst_17 = arith.constant 0.000000e+00 : f32
      %17 = vector.broadcast %cst_17 : f32 to vector<128x128xf32>
      %c0_18 = arith.constant 0 : index
      %c0_19 = arith.constant 0 : index
      %18 = vector.load %arg7[%c0_18, %c0_19] : memref<128x128xf32, #tpu.memory_space<vmem>>, vector<128x128xf32>
      tpu.vector_store %arg7[%c0_18, %c0_19], %17 {strides = array<i32>} : memref<128x128xf32, #tpu.memory_space<vmem>>, vector<128x128xf32>,
      %cst_20 = arith.constant 0.000000e+00 : f32
      %19 = vector.broadcast %cst_20 : f32 to vector<128x128xf32>
      %c0_21 = arith.constant 0 : index
      %c0_22 = arith.constant 0 : index
      %20 = vector.load %arg8[%c0_21, %c0_22] : memref<128x128xf32, #tpu.memory_space<vmem>>, vector<128x128xf32>
      tpu.vector_store %arg8[%c0_21, %c0_22], %19 {strides = array<i32>} : memref<128x128xf32, #tpu.memory_space<vmem>>, vector<128x128xf32>,
    } else {
    }
    %c0 = arith.constant 0 : index
    %c0_1 = arith.constant 0 : index
    %3 = vector.load %arg2[%c0, %c0_1] : memref<128x128xbf16, #tpu.memory_space<vmem>>, vector<128x128xbf16>
    %c0_2 = arith.constant 0 : index
    %c0_3 = arith.constant 0 : index
    %4 = vector.load %arg7[%c0_2, %c0_3] : memref<128x128xf32, #tpu.memory_space<vmem>>, vector<128x128xf32>
    %c0_4 = arith.constant 0 : index
    %c0_5 = arith.constant 0 : index
    %5 = vector.load %arg3[%c0_4, %c0_5] : memref<128x128xbf16, #tpu.memory_space<vmem>>, vector<128x128xbf16>
    %cst = arith.constant dense<0.000000e+00> : vector<128x128xf32>
    %6 = tpu.matmul %3, %5, %cst {dimension_numbers = #tpu.dot_dimension_numbers<[1], [0], [0], [1], [0, 0, 1, 1], [], []>} : vector<128x128xbf16>, vector<128x128xbf16>, vector<128x128xf32> -> vector<128x128xf32>
    %7 = arith.addf %4, %6 : vector<128x128xf32>
    %c0_6 = arith.constant 0 : index
    %c0_7 = arith.constant 0 : index
    %8 = vector.load %arg7[%c0_6, %c0_7] : memref<128x128xf32, #tpu.memory_space<vmem>>, vector<128x128xf32>
    tpu.vector_store %arg7[%c0_6, %c0_7], %7 {strides = array<i32>} : memref<128x128xf32, #tpu.memory_space<vmem>>, vector<128x128xf32>,
    %c0_8 = arith.constant 0 : index
    %c0_9 = arith.constant 0 : index
    %9 = vector.load %arg8[%c0_8, %c0_9] : memref<128x128xf32, #tpu.memory_space<vmem>>, vector<128x128xf32>
    %c0_10 = arith.constant 0 : index
    %c0_11 = arith.constant 0 : index
    %10 = vector.load %arg4[%c0_10, %c0_11] : memref<128x128xbf16, #tpu.memory_space<vmem>>, vector<128x128xbf16>
    %cst_12 = arith.constant dense<0.000000e+00> : vector<128x128xf32>
    %11 = tpu.matmul %3, %10, %cst_12 {dimension_numbers = #tpu.dot_dimension_numbers<[1], [0], [0], [1], [0, 0, 1, 1], [], []>} : vector<128x128xbf16>, vector<128x128xbf16>, vector<128x128xf32> -> vector<128x128xf32>
    %12 = arith.addf %9, %11 : vector<128x128xf32>
    %c0_13 = arith.constant 0 : index
    %c0_14 = arith.constant 0 : index
    %13 = vector.load %arg8[%c0_13, %c0_14] : memref<128x128xf32, #tpu.memory_space<vmem>>, vector<128x128xf32>
    tpu.vector_store %arg8[%c0_13, %c0_14], %12 {strides = array<i32>} : memref<128x128xf32, #tpu.memory_space<vmem>>, vector<128x128xf32>,
    %c0_i32_15 = arith.constant 0 : i32
    %14 = arith.cmpi eq, %arg1, %c0_i32_15 : i32
    %15 = arith.extui %14 : i1 to i32
    %c0_i32_16 = arith.constant 0 : i32
    %16 = arith.cmpi ne, %15, %c0_i32_16 : i32
    scf.if %16 {
      %c0_17 = arith.constant 0 : index
      %c0_18 = arith.constant 0 : index
      %17 = vector.load %arg7[%c0_17, %c0_18] : memref<128x128xf32, #tpu.memory_space<vmem>>, vector<128x128xf32>
      %18 = arith.truncf %17 : vector<128x128xf32> to vector<128x128xbf16>
      %c0_19 = arith.constant 0 : index
      %c0_20 = arith.constant 0 : index
      %19 = vector.load %arg5[%c0_19, %c0_20] : memref<128x128xbf16, #tpu.memory_space<vmem>>, vector<128x128xbf16>
      tpu.vector_store %arg5[%c0_19, %c0_20], %18 {strides = array<i32>} : memref<128x128xbf16, #tpu.memory_space<vmem>>, vector<128x128xbf16>,
      %c0_21 = arith.constant 0 : index
      %c0_22 = arith.constant 0 : index
      %20 = vector.load %arg8[%c0_21, %c0_22] : memref<128x128xf32, #tpu.memory_space<vmem>>, vector<128x128xf32>
      %21 = arith.truncf %20 : vector<128x128xf32> to vector<128x128xbf16>
      %c0_23 = arith.constant 0 : index
      %c0_24 = arith.constant 0 : index
      %22 = vector.load %arg6[%c0_23, %c0_24] : memref<128x128xbf16, #tpu.memory_space<vmem>>, vector<128x128xbf16>
      tpu.vector_store %arg6[%c0_23, %c0_24], %21 {strides = array<i32>} : memref<128x128xbf16, #tpu.memory_space<vmem>>, vector<128x128xbf16>,
    } else {
    }
    return
  }
  func.func @transform_0(%arg0: i32, %arg1: i32) -> (i32, i32) {
    %c0_i32 = arith.constant 0 : i32
    return %arg0, %arg1 : i32, i32
  }
  func.func @transform_1(%arg0: i32, %arg1: i32) -> (i32, i32) {
    %c0_i32 = arith.constant 0 : i32
    %c0_i32_0 = arith.constant 0 : i32
    return %arg1, %c0_i32 : i32, i32
  }
  func.func @transform_2(%arg0: i32, %arg1: i32) -> (i32, i32) {
    %c0_i32 = arith.constant 0 : i32
    %c0_i32_0 = arith.constant 0 : i32
    return %arg1, %c0_i32 : i32, i32
  }
  func.func @transform_3(%arg0: i32, %arg1: i32) -> (i32, i32) {
    %c0_i32 = arith.constant 0 : i32
    %c0_i32_0 = arith.constant 0 : i32
    return %arg0, %c0_i32 : i32, i32
  }
  func.func @transform_4(%arg0: i32, %arg1: i32) -> (i32, i32) {
    %c0_i32 = arith.constant 0 : i32
    %c0_i32_0 = arith.constant 0 : i32
    return %arg0, %c0_i32 : i32, i32
  }
}

module attributes {stable_mosaic.version = 11 : i64} {
  func.func @_mlp_kernel(%arg0: i32, %arg1: memref<128x128xbf16, #tpu.memory_space<vmem>>, %arg2: memref<128x128xbf16, #tpu.memory_space<vmem>>, %arg3: memref<128x128xbf16, #tpu.memory_space<vmem>>, %arg4: memref<128x128xbf16, #tpu.memory_space<vmem>>, %arg5: memref<512x128xbf16, #tpu.memory_space<vmem>>, %arg6: memref<1x128xf32, #tpu.memory_space<vmem>>, %arg7: memref<128x128xbf16, #tpu.memory_space<vmem>>, %arg8: memref<1x128xf32, #tpu.memory_space<vmem>>, %arg9: memref<128x128xf32, #tpu.memory_space<vmem>>) attributes {dimension_semantics = [#tpu.dimension_semantics<parallel>], iteration_bounds = array<i64: 1>, scalar_prefetch = 0 : i64, scratch_operands = 0 : i64, tpu.core_type = #tpu.core_type<tc>, window_params = [{transform_indices = @transform_0, window_bounds = array<i64: 128, 128>}, {transform_indices = @transform_1, window_bounds = array<i64: 128, 128>}, {transform_indices = @transform_2, window_bounds = array<i64: 128, 128>}, {transform_indices = @transform_3, window_bounds = array<i64: 128, 128>}, {pipeline_mode = #tpu.pipeline_mode<synchronous>, transform_indices = @transform_4, window_bounds = array<i64: 512, 128>}, {pipeline_mode = #tpu.pipeline_mode<synchronous>, transform_indices = @transform_5, window_bounds = array<i64: 1, 128>}, {pipeline_mode = #tpu.pipeline_mode<synchronous>, transform_indices = @transform_6, window_bounds = array<i64: 128, 128>}, {pipeline_mode = #tpu.pipeline_mode<synchronous>, transform_indices = @transform_7, window_bounds = array<i64: 1, 128>}, {transform_indices = @transform_8, window_bounds = array<i64: 128, 128>}]} {
    %c0 = arith.constant 0 : index
    %c0_0 = arith.constant 0 : index
    %0 = vector.load %arg1[%c0, %c0_0] : memref<128x128xbf16, #tpu.memory_space<vmem>>, vector<128x128xbf16>
    %c0_1 = arith.constant 0 : index
    %c0_2 = arith.constant 0 : index
    %1 = vector.load %arg5[%c0_1, %c0_2] : memref<512x128xbf16, #tpu.memory_space<vmem>>, vector<128x128xbf16>
    %cst = arith.constant dense<0.000000e+00> : vector<128x128xf32>
    %2 = tpu.matmul %0, %1, %cst {dimension_numbers = #tpu.dot_dimension_numbers<[1], [0], [0], [1], [0, 0, 1, 1], [], []>} : vector<128x128xbf16>, vector<128x128xbf16>, vector<128x128xf32> -> vector<128x128xf32>
    %c0_3 = arith.constant 0 : index
    %c0_4 = arith.constant 0 : index
    %3 = vector.load %arg2[%c0_3, %c0_4] : memref<128x128xbf16, #tpu.memory_space<vmem>>, vector<128x128xbf16>
    %c128 = arith.constant 128 : index
    %c0_5 = arith.constant 0 : index
    %4 = vector.load %arg5[%c128, %c0_5] : memref<512x128xbf16, #tpu.memory_space<vmem>>, vector<128x128xbf16>
    %cst_6 = arith.constant dense<0.000000e+00> : vector<128x128xf32>
    %5 = tpu.matmul %3, %4, %cst_6 {dimension_numbers = #tpu.dot_dimension_numbers<[1], [0], [0], [1], [0, 0, 1, 1], [], []>} : vector<128x128xbf16>, vector<128x128xbf16>, vector<128x128xf32> -> vector<128x128xf32>
    %6 = arith.addf %2, %5 : vector<128x128xf32>
    %c0_7 = arith.constant 0 : index
    %c0_8 = arith.constant 0 : index
    %7 = vector.load %arg3[%c0_7, %c0_8] : memref<128x128xbf16, #tpu.memory_space<vmem>>, vector<128x128xbf16>
    %c256 = arith.constant 256 : index
    %c0_9 = arith.constant 0 : index
    %8 = vector.load %arg5[%c256, %c0_9] : memref<512x128xbf16, #tpu.memory_space<vmem>>, vector<128x128xbf16>
    %cst_10 = arith.constant dense<0.000000e+00> : vector<128x128xf32>
    %9 = tpu.matmul %7, %8, %cst_10 {dimension_numbers = #tpu.dot_dimension_numbers<[1], [0], [0], [1], [0, 0, 1, 1], [], []>} : vector<128x128xbf16>, vector<128x128xbf16>, vector<128x128xf32> -> vector<128x128xf32>
    %10 = arith.addf %6, %9 : vector<128x128xf32>
    %c0_11 = arith.constant 0 : index
    %c0_12 = arith.constant 0 : index
    %11 = vector.load %arg4[%c0_11, %c0_12] : memref<128x128xbf16, #tpu.memory_space<vmem>>, vector<128x128xbf16>
    %c384 = arith.constant 384 : index
    %c0_13 = arith.constant 0 : index
    %12 = vector.load %arg5[%c384, %c0_13] : memref<512x128xbf16, #tpu.memory_space<vmem>>, vector<128x128xbf16>
    %cst_14 = arith.constant dense<0.000000e+00> : vector<128x128xf32>
    %13 = tpu.matmul %11, %12, %cst_14 {dimension_numbers = #tpu.dot_dimension_numbers<[1], [0], [0], [1], [0, 0, 1, 1], [], []>} : vector<128x128xbf16>, vector<128x128xbf16>, vector<128x128xf32> -> vector<128x128xf32>
    %14 = arith.addf %10, %13 : vector<128x128xf32>
    %c0_15 = arith.constant 0 : index
    %c0_16 = arith.constant 0 : index
    %15 = vector.load %arg6[%c0_15, %c0_16] : memref<1x128xf32, #tpu.memory_space<vmem>>, vector<1x128xf32>
    %16 = vector.broadcast %15 : vector<1x128xf32> to vector<128x128xf32>
    %17 = arith.addf %14, %16 : vector<128x128xf32>
    %cst_17 = arith.constant 0.000000e+00 : f32
    %18 = vector.broadcast %cst_17 : f32 to vector<128x128xf32>
    %19 = arith.maximumf %17, %18 : vector<128x128xf32>
    %20 = arith.truncf %19 : vector<128x128xf32> to vector<128x128xbf16>
    %c0_18 = arith.constant 0 : index
    %c0_19 = arith.constant 0 : index
    %21 = vector.load %arg7[%c0_18, %c0_19] : memref<128x128xbf16, #tpu.memory_space<vmem>>, vector<128x128xbf16>
    %cst_20 = arith.constant dense<0.000000e+00> : vector<128x128xf32>
    %22 = tpu.matmul %20, %21, %cst_20 {dimension_numbers = #tpu.dot_dimension_numbers<[1], [0], [0], [1], [0, 0, 1, 1], [], []>} : vector<128x128xbf16>, vector<128x128xbf16>, vector<128x128xf32> -> vector<128x128xf32>
    %c0_21 = arith.constant 0 : index
    %c0_22 = arith.constant 0 : index
    %23 = vector.load %arg8[%c0_21, %c0_22] : memref<1x128xf32, #tpu.memory_space<vmem>>, vector<1x128xf32>
    %24 = vector.broadcast %23 : vector<1x128xf32> to vector<128x128xf32>
    %25 = arith.addf %22, %24 : vector<128x128xf32>
    %cst_23 = arith.constant 0.000000e+00 : f32
    %26 = vector.broadcast %cst_23 : f32 to vector<128x128xf32>
    %27 = arith.maximumf %25, %26 : vector<128x128xf32>
    %c0_24 = arith.constant 0 : index
    %c0_25 = arith.constant 0 : index
    %28 = vector.load %arg9[%c0_24, %c0_25] : memref<128x128xf32, #tpu.memory_space<vmem>>, vector<128x128xf32>
    tpu.vector_store %arg9[%c0_24, %c0_25], %27 {strides = array<i32>} : memref<128x128xf32, #tpu.memory_space<vmem>>, vector<128x128xf32>,
    return
  }
  func.func @transform_0(%arg0: i32) -> (i32, i32) {
    %c0_i32 = arith.constant 0 : i32
    %c0_i32_0 = arith.constant 0 : i32
    return %arg0, %c0_i32 : i32, i32
  }
  func.func @transform_1(%arg0: i32) -> (i32, i32) {
    %c0_i32 = arith.constant 0 : i32
    %c0_i32_0 = arith.constant 0 : i32
    return %arg0, %c0_i32 : i32, i32
  }
  func.func @transform_2(%arg0: i32) -> (i32, i32) {
    %c0_i32 = arith.constant 0 : i32
    %c0_i32_0 = arith.constant 0 : i32
    return %arg0, %c0_i32 : i32, i32
  }
  func.func @transform_3(%arg0: i32) -> (i32, i32) {
    %c0_i32 = arith.constant 0 : i32
    %c0_i32_0 = arith.constant 0 : i32
    return %arg0, %c0_i32 : i32, i32
  }
  func.func @transform_4(%arg0: i32) -> (i32, i32) {
    %c0_i32 = arith.constant 0 : i32
    %c0_i32_0 = arith.constant 0 : i32
    %c0_i32_1 = arith.constant 0 : i32
    return %c0_i32, %c0_i32_0 : i32, i32
  }
  func.func @transform_5(%arg0: i32) -> (i32, i32) {
    %c0_i32 = arith.constant 0 : i32
    %c0_i32_0 = arith.constant 0 : i32
    %c0_i32_1 = arith.constant 0 : i32
    return %c0_i32, %c0_i32_0 : i32, i32
  }
  func.func @transform_6(%arg0: i32) -> (i32, i32) {
    %c0_i32 = arith.constant 0 : i32
    %c0_i32_0 = arith.constant 0 : i32
    %c0_i32_1 = arith.constant 0 : i32
    return %c0_i32, %c0_i32_0 : i32, i32
  }
  func.func @transform_7(%arg0: i32) -> (i32, i32) {
    %c0_i32 = arith.constant 0 : i32
    %c0_i32_0 = arith.constant 0 : i32
    %c0_i32_1 = arith.constant 0 : i32
    return %c0_i32, %c0_i32_0 : i32, i32
  }
  func.func @transform_8(%arg0: i32) -> (i32, i32) {
    %c0_i32 = arith.constant 0 : i32
    %c0_i32_0 = arith.constant 0 : i32
    return %arg0, %c0_i32 : i32, i32
  }
}

</mosaic_0001>

<bundles_post_ra>
// kernel: tpu_custom_call.1
= control target key start
LH: loop header
LB: loop body
LE: loop exit
PB: predicated region body
PF: predicated region fallthrough
CT: control target
= control target key end

     0   :  { %6 = vsyncpa [#allocation3], 0  ;;  %s124_s0 = inlined_call_operand.hbm [shape: f32[8,128], index: 0, kind: input, shape index: {}]   ;;  %s125_s1 = inlined_call_operand.hbm [shape: f32[8,128], index: 1, kind: output, shape index: {}]  }
   0x1   :  { %7 = vsyncpa [#allocation4], 0  ;;  %s88_s6 = smov [#allocation2]   ;;  %s40_s10 = scalar_lea.hbm %s124_s0, 128 }
   0x2   :  { %s14_s7 = sshll.u32 %s88_s6, 4  ;;  %p41_p0 = scmp.ne.s32.totalorder %s124_s0, %s40_s10  ;;  %s15_s7 = int_to_ptr.vmem [resolvable:$true] %s14_s7 }
   0x3   :  { %p44_p1 = scmp.lt.u32.totalorder %s40_s10, %s124_s0 }
   0x5   :  { %p46_p2 = pnand %p44_p1, %p41_p0 }
   0x7   :  { %49 = shalt.err (!%p46_p2)
}
   0x8   :  { %s50_s15 = scalar_lea.vmem %s15_s7, 128  ;;  %p55_p4 = scmp.lt.s32.totalorder %s15_s7, %s15_s7 }
   0x9   :  { %p51_p3 = scmp.ne.s32.totalorder %s15_s7, %s50_s15  ;;  %p56_p5 = scmp.lt.s32.totalorder %s50_s15, %s50_s15 }
   0xb   :  { %p57_p6 = por %p56_p5, %p55_p4 }
   0xd   :  { %p58_p7 = pnand %p57_p6, %p51_p3 }
   0xf   :  { %61 = shalt.err (!%p58_p7)
}
  0x10   :  { %17 = dma.hbm_to_vmem [thread:$0]  %s124_s0, 128, %s15_s7, [#allocation3]  }
  0x11   :  { %84 = dma.done.wait [#allocation3], 128  }
  0x12   :  { %85 = vsyncadd [#allocation3], 4294967168  ;;  %s89_s18 = smov [#allocation5]   ;;  %v21_v0 = vld [vmem:[#allocation2] sm:$0xff] }
  0x13   :  { %s29_s19 = sshll.u32 %s89_s18, 4  ;;  %22 = vst [vmem:[#allocation5] sm:$0xff] %v21_v0  ;;  %s30_s19 = int_to_ptr.vmem [resolvable:$true] %s29_s19 }
  0x14   :  { %s62_s20 = scalar_lea.vmem %s30_s19, 128  ;;  %p67_p9 = scmp.lt.s32.totalorder %s30_s19, %s30_s19 }
  0x15   :  { %p63_p8 = scmp.ne.s32.totalorder %s30_s19, %s62_s20  ;;  %p68_p10 = scmp.lt.s32.totalorder %s62_s20, %s62_s20 }
  0x17   :  { %p69_p11 = por %p68_p10, %p67_p9 }
  0x19   :  { %p70_p12 = pnand %p69_p11, %p63_p8 }
  0x1b   :  { %73 = shalt.err (!%p70_p12)
}
  0x1c   :  { %s74_s23 = scalar_lea.hbm %s125_s1, 128 }
  0x1d   :  { %p75_p13 = scmp.ne.s32.totalorder %s125_s1, %s74_s23  ;;  %p78_p0 = scmp.lt.u32.totalorder %s74_s23, %s125_s1 }
  0x1f   :  { %p80_p1 = pnand %p78_p0, %p75_p13 }
  0x21   :  { %83 = shalt.err (!%p80_p1)
}
  0x22   :  { %32 = dma.vmem_to_hbm [thread:$0]  %s30_s19, 128, %s125_s1, [#allocation4]  }
  0x23   :  { %86 = dma.done.wait [#allocation4], 128  }
  0x24   :  { %87 = vsyncadd [#allocation4], 4294967168 }
  0x25   :  { %36 = vsyncpa [#allocation3], 1 }
  0x26   :  { %37 = vsyncpa [#allocation4], 1 }

// kernel: parallel_layer_forward.9
= control target key start
LH: loop header
LB: loop body
LE: loop exit
PB: predicated region body
PF: predicated region fallthrough
CT: control target
= control target key end

     0   :  { %s670_s1 = inlined_call_operand.vmem [shape: bf16[128,128], index: 1, kind: input, shape index: {}]   ;;  %s671_s0 = inlined_call_operand.vmem [shape: bf16[128,128], index: 0, kind: input, shape index: {}]   ;;  %s672_s2 = inlined_call_operand.vmem [shape: bf16[128,128], index: 2, kind: output, shape index: {}]  }
   0x1   :  { %v567_v0 = vld [vmem:[%s670_s1] sm:$0xff]   ;;  %v568_v1 = vld [vmem:[%s670_s1 + $0x8] sm:$0xff]   ;;  %v569_v2 = vld [vmem:[%s670_s1 + $0x10] sm:$0xff]  }
   0x2   :  { %519 = vmatprep.subr.bf16.mxu0 %v567_v0  ;;  %551 = vmatprep.subr.bf16.mxu1 %v567_v0  ;;  %v570_v3 = vld [vmem:[%s670_s1 + $0x18] sm:$0xff]   ;;  %v575_v4 = vld [vmem:[%s671_s0] sm:$0xff]   ;;  %v572_v7 = vld [vmem:[%s670_s1 + $0x28] sm:$0xff]  }
   0x3   :  { %520 = vmatpush3.bf16.msra.mxu0 %v567_v0  ;;  %559 = vmatpush3.bf16.msra.mxu1 %v567_v0  ;;  %v576_v5 = vld [vmem:[%s671_s0 + $0x20] sm:$0xff]   ;;  %v573_v8 = vld [vmem:[%s670_s1 + $0x30] sm:$0xff]   ;;  %v574_v9 = vld [vmem:[%s670_s1 + $0x38] sm:$0xff]  }
   0x4   :  { %521 = vmatprep.subr.bf16.mxu0 %v568_v1  ;;  %552 = vmatprep.subr.bf16.mxu1 %v568_v1  ;;  %v571_v6 = vld [vmem:[%s670_s1 + $0x20] sm:$0xff]   ;;  %v577_v10 = vld [vmem:[%s671_s0 + $0x8] sm:$0xff]   ;;  %v579_v12 = vld [vmem:[%s671_s0 + $0x10] sm:$0xff]  }
   0x5   :  { %535 = vmatprep.mubr.bf16.mxu0 %v575_v4  ;;  %543 = vmatprep.mubr.bf16.mxu1 %v576_v5  ;;  %v578_v11 = vld [vmem:[%s671_s0 + $0x28] sm:$0xff]   ;;  %v580_v13 = vld [vmem:[%s671_s0 + $0x30] sm:$0xff]   ;;  %v581_v14 = vld [vmem:[%s671_s0 + $0x18] sm:$0xff]  }
   0x6   :  { %v582_v15 = vld [vmem:[%s671_s0 + $0x38] sm:$0xff]  }
   0x7   :  { %522 = vmatpush3.bf16.msra.mxu0 %v568_v1  ;;  %560 = vmatpush3.bf16.msra.mxu1 %v568_v1 }
   0x8   :  { %523 = vmatprep.subr.bf16.mxu0 %v569_v2  ;;  %553 = vmatprep.subr.bf16.mxu1 %v569_v2 }
   0xb   :  { %524 = vmatpush3.bf16.msra.mxu0 %v569_v2  ;;  %561 = vmatpush3.bf16.msra.mxu1 %v569_v2 }
   0xc   :  { %525 = vmatprep.subr.bf16.mxu0 %v570_v3  ;;  %554 = vmatprep.subr.bf16.mxu1 %v570_v3 }
   0xf   :  { %526 = vmatpush3.bf16.msra.mxu0 %v570_v3  ;;  %562 = vmatpush3.bf16.msra.mxu1 %v570_v3 }
  0x10   :  { %527 = vmatprep.subr.bf16.mxu0 %v571_v6  ;;  %555 = vmatprep.subr.bf16.mxu1 %v571_v6 }
  0x13   :  { %528 = vmatpush3.bf16.msra.mxu0 %v571_v6  ;;  %563 = vmatpush3.bf16.msra.mxu1 %v571_v6 }
  0x14   :  { %529 = vmatprep.subr.bf16.mxu0 %v572_v7  ;;  %556 = vmatprep.subr.bf16.mxu1 %v572_v7 }
  0x17   :  { %530 = vmatpush3.bf16.msra.mxu0 %v572_v7  ;;  %564 = vmatpush3.bf16.msra.mxu1 %v572_v7 }
  0x18   :  { %531 = vmatprep.subr.bf16.mxu0 %v573_v8  ;;  %557 = vmatprep.subr.bf16.mxu1 %v573_v8 }
  0x1b   :  { %532 = vmatpush3.bf16.msra.mxu0 %v573_v8  ;;  %565 = vmatpush3.bf16.msra.mxu1 %v573_v8 }
  0x1c   :  { %533 = vmatprep.subr.bf16.mxu0 %v574_v9  ;;  %558 = vmatprep.subr.bf16.mxu1 %v574_v9 }
  0x1f   :  { %534 = vmatpush3.bf16.msra.mxu0 %v574_v9  ;;  %566 = vmatpush3.bf16.msra.mxu1 %v574_v9 }
  0x22   :  { %536 = vmatmul.mubr.bf16.vlgmr.msra.gmra.mrb[0].mxu0 %v577_v10  ;;  %544 = vmatmul.mubr.bf16.vlgmr.msra.gmra.mrb[0].mxu1 %v578_v11 }
  0x23   :  { %539 = vmatprep.mubr.bf16.mxu0 %v579_v12  ;;  %547 = vmatprep.mubr.bf16.mxu1 %v580_v13 }
  0x2a   :  { %540 = vmatmul.mubr.bf16.gmra.mrb[4].mxu0 %v581_v14  ;;  %548 = vmatmul.mubr.bf16.gmra.mrb[4].mxu1 %v582_v15 }
  0xf5   :  { %v537_v16 = vpop.f32.mrb[0].mxu0  ;;  %v545_v17 = vpop.f32.mrb[0].mxu1 }
  0xf6   :  { %v210_v18 = vpop.f32.mrb[1].mxu0  ;;  %v242_v19 = vpop.f32.mrb[1].mxu1 }
  0xf7   :  { %v538_v20 = vpop.f32.mrb[2].mxu0  ;;  %v546_v21 = vpop.f32.mrb[2].mxu1 }
  0xf8   :  { %v464_v22 = vpack.c.bf16 %v538_v20, %v537_v16  ;;  %v484_v23 = vpack.c.bf16 %v546_v21, %v545_v17  ;;  %v213_v24 = vpop.f32.mrb[3].mxu0  ;;  %v245_v25 = vpop.f32.mrb[3].mxu1 }
  0xf9   :  { %v459_v26 = vpack.c.bf16 %v213_v24, %v210_v18  ;;  %v479_v27 = vpack.c.bf16 %v245_v25, %v242_v19 }
  0xfa   :  { %496 = vst [vmem:[%s672_s2 + $0x8] sm:$0xff] %v464_v22   ;;  %500 = vst [vmem:[%s672_s2 + $0x28] sm:$0xff] %v484_v23  }
  0xfb   :  { %460 = vst [vmem:[%s672_s2] sm:$0xff] %v459_v26   ;;  %499 = vst [vmem:[%s672_s2 + $0x20] sm:$0xff] %v479_v27  }
  0xfd   :  { %v541_v28 = vpop.f32.mrb[4].mxu0  ;;  %v549_v29 = vpop.f32.mrb[4].mxu1 }
  0xfe   :  { %v226_v30 = vpop.f32.mrb[5].mxu0  ;;  %v258_v31 = vpop.f32.mrb[5].mxu1 }
  0xff   :  { %v542_v32 = vpop.f32.mrb[6].mxu0  ;;  %v550_v33 = vpop.f32.mrb[6].mxu1 }
 0x100   :  { %v474_v34 = vpack.c.bf16 %v542_v32, %v541_v28  ;;  %v494_v35 = vpack.c.bf16 %v550_v33, %v549_v29  ;;  %v229_v36 = vpop.f32.mrb[7].mxu0  ;;  %v261_v37 = vpop.f32.mrb[7].mxu1 }
 0x101   :  { %v469_v38 = vpack.c.bf16 %v229_v36, %v226_v30  ;;  %v489_v39 = vpack.c.bf16 %v261_v37, %v258_v31 }
 0x102   :  { %498 = vst [vmem:[%s672_s2 + $0x18] sm:$0xff] %v474_v34   ;;  %502 = vst [vmem:[%s672_s2 + $0x38] sm:$0xff] %v494_v35  }
 0x103   :  { %497 = vst [vmem:[%s672_s2 + $0x10] sm:$0xff] %v469_v38   ;;  %501 = vst [vmem:[%s672_s2 + $0x30] sm:$0xff] %v489_v39  }

// kernel: parallel_layer_forward.11
= control target key start
LH: loop header
LB: loop body
LE: loop exit
PB: predicated region body
PF: predicated region fallthrough
CT: control target
= control target key end

     0   :  { %s902_s1 = inlined_call_operand.vmem [shape: bf16[128,128], index: 1, kind: input, shape index: {}]   ;;  %s903_s0 = inlined_call_operand.vmem [shape: bf16[128,128], index: 0, kind: input, shape index: {}]   ;;  %s904_s3 = inlined_call_operand.vmem [shape: bf16[128,128], index: 3, kind: input, shape index: {}]   ;;  %s905_s2 = inlined_call_operand.vmem [shape: f32[1,128], index: 2, kind: input, shape index: {}]   ;;  %s906_s4 = inlined_call_operand.vmem [shape: f32[1,128], index: 4, kind: input, shape index: {}]   ;;  %s907_s5 = inlined_call_operand.vmem [shape: bf16[128,128], index: 5, kind: output, shape index: {}]  }
   0x1   :  { %v746_v0 = vld [vmem:[%s902_s1] sm:$0xff]   ;;  %v747_v1 = vld [vmem:[%s902_s1 + $0x8] sm:$0xff]   ;;  %v748_v2 = vld [vmem:[%s902_s1 + $0x10] sm:$0xff]  }
   0x2   :  { %682 = vmatprep.subr.bf16.mxu0 %v746_v0  ;;  %v749_v3 = vld [vmem:[%s902_s1 + $0x18] sm:$0xff]   ;;  %v754_v4 = vld [vmem:[%s903_s0] sm:$0xff]   ;;  %v751_v6 = vld [vmem:[%s902_s1 + $0x28] sm:$0xff]  }
   0x3   :  { %683 = vmatpush3.bf16.msra.mxu0 %v746_v0  ;;  %698 = vmatprep.mubr.bf16.mxu0 %v754_v4  ;;  %v750_v5 = vld [vmem:[%s902_s1 + $0x20] sm:$0xff]   ;;  %v763_v8 = vld [vmem:[%s904_s3 + $0x8] sm:$0xff]   ;;  %v752_v9 = vld [vmem:[%s902_s1 + $0x30] sm:$0xff]  }
   0x4   :  { %684 = vmatprep.subr.bf16.mxu0 %v747_v1  ;;  %v762_v7 = vld [vmem:[%s904_s3] sm:$0xff]   ;;  %v764_v10 = vld [vmem:[%s904_s3 + $0x10] sm:$0xff]   ;;  %v753_v11 = vld [vmem:[%s902_s1 + $0x38] sm:$0xff]  }
   0x5   :  { %714 = vmatprep.subr.bf16.mxu1 %v762_v7  ;;  %v765_v12 = vld [vmem:[%s904_s3 + $0x18] sm:$0xff]   ;;  %v766_v13 = vld [vmem:[%s904_s3 + $0x20] sm:$0xff]   ;;  %v755_v14 = vld [vmem:[%s903_s0 + $0x8] sm:$0xff]  }
   0x6   :  { %715 = vmatpush3.bf16.msra.mxu1 %v762_v7  ;;  %v756_v15 = vld [vmem:[%s903_s0 + $0x10] sm:$0xff]   ;;  %v767_v16 = vld [vmem:[%s904_s3 + $0x28] sm:$0xff]   ;;  %v757_v17 = vld [vmem:[%s903_s0 + $0x18] sm:$0xff]  }
   0x7   :  { %685 = vmatpush3.bf16.msra.mxu0 %v747_v1  ;;  %716 = vmatprep.subr.bf16.mxu1 %v763_v8  ;;  %v758_v18 = vld [vmem:[%s903_s0 + $0x20] sm:$0xff]   ;;  %v759_v19 = vld [vmem:[%s903_s0 + $0x28] sm:$0xff]   ;;  %v760_v20 = vld [vmem:[%s903_s0 + $0x30] sm:$0xff]  }
   0x8   :  { %686 = vmatprep.subr.bf16.mxu0 %v748_v2  ;;  %v761_v21 = vld [vmem:[%s903_s0 + $0x38] sm:$0xff]   ;;  %v768_v22 = vld [vmem:[%s904_s3 + $0x30] sm:$0xff]   ;;  %v545_v24 = vld [vmem:[%s905_s2] ss:$0 sm:$0xff] }
   0x9   :  { %v769_v23 = vld [vmem:[%s904_s3 + $0x38] sm:$0xff]  }
   0xa   :  { %717 = vmatpush3.bf16.msra.mxu1 %v763_v8 }
   0xb   :  { %687 = vmatpush3.bf16.msra.mxu0 %v748_v2  ;;  %718 = vmatprep.subr.bf16.mxu1 %v764_v10 }
   0xc   :  { %688 = vmatprep.subr.bf16.mxu0 %v749_v3 }
   0xe   :  { %719 = vmatpush3.bf16.msra.mxu1 %v764_v10 }
   0xf   :  { %689 = vmatpush3.bf16.msra.mxu0 %v749_v3  ;;  %720 = vmatprep.subr.bf16.mxu1 %v765_v12 }
  0x10   :  { %690 = vmatprep.subr.bf16.mxu0 %v750_v5 }
  0x12   :  { %721 = vmatpush3.bf16.msra.mxu1 %v765_v12 }
  0x13   :  { %691 = vmatpush3.bf16.msra.mxu0 %v750_v5  ;;  %722 = vmatprep.subr.bf16.mxu1 %v766_v13 }
  0x14   :  { %692 = vmatprep.subr.bf16.mxu0 %v751_v6 }
  0x16   :  { %723 = vmatpush3.bf16.msra.mxu1 %v766_v13 }
  0x17   :  { %693 = vmatpush3.bf16.msra.mxu0 %v751_v6  ;;  %724 = vmatprep.subr.bf16.mxu1 %v767_v16 }
  0x18   :  { %694 = vmatprep.subr.bf16.mxu0 %v752_v9 }
  0x1a   :  { %725 = vmatpush3.bf16.msra.mxu1 %v767_v16 }
  0x1b   :  { %695 = vmatpush3.bf16.msra.mxu0 %v752_v9  ;;  %726 = vmatprep.subr.bf16.mxu1 %v768_v22 }
  0x1c   :  { %696 = vmatprep.subr.bf16.mxu0 %v753_v11 }
  0x1e   :  { %727 = vmatpush3.bf16.msra.mxu1 %v768_v22 }
  0x1f   :  { %697 = vmatpush3.bf16.msra.mxu0 %v753_v11  ;;  %728 = vmatprep.subr.bf16.mxu1 %v769_v23 }
  0x22   :  { %699 = vmatmul.mubr.bf16.vlgmr.msra.gmra.mrb[0].mxu0 %v755_v14  ;;  %729 = vmatpush3.bf16.msra.mxu1 %v769_v23 }
  0x23   :  { %702 = vmatprep.mubr.bf16.mxu0 %v756_v15 }
  0x2a   :  { %703 = vmatmul.mubr.bf16.gmra.mrb[4].mxu0 %v757_v17  ;;  %v562_v17 = vld [vmem:[%s906_s4] ss:$0 sm:$0xff] }
  0x2b   :  { %706 = vmatprep.mubr.bf16.mxu0 %v758_v18 }
  0x32   :  { %707 = vmatmul.mubr.bf16.gmra.mrb[8].mxu0 %v759_v19 }
  0x33   :  { %710 = vmatprep.mubr.bf16.mxu0 %v760_v20 }
  0x3a   :  { %711 = vmatmul.mubr.bf16.gmra.mrb[12].mxu0 %v761_v21 }
  0xf5   :  { %v700_v25 = vpop.f32.mrb[0].mxu0 }
  0xf6   :  { %v199_v26 = vadd.f32 %v700_v25, %v545_v24  ;;  %v190_v27 = vpop.f32.mrb[1].mxu0 }
  0xf7   :  { %v191_v28 = vadd.f32 %v545_v24, %v190_v27  ;;  %v701_v29 = vpop.f32.mrb[2].mxu0 }
  0xf8   :  { %v202_v30 = vadd.f32 %v701_v29, %v545_v24  ;;  %v193_v31 = vpop.f32.mrb[3].mxu0  ;;  %v255_v33 = vmax.f32 %v199_v26, 0.0 }
  0xf9   :  { %v194_v32 = vadd.f32 %v545_v24, %v193_v31  ;;  %v253_v35 = vmax.f32 %v191_v28, 0.0 }
  0xfa   :  { %v256_v34 = vmax.f32 %v202_v30, 0.0 }
  0xfb   :  { %v254_v36 = vmax.f32 %v194_v32, 0.0 }
  0xfc   :  { %v270_v37 = vpack.c.bf16 %v256_v34, %v255_v33 }
  0xfd   :  { %v704_v38 = vpop.f32.mrb[4].mxu0  ;;  %v269_v39 = vpack.c.bf16 %v254_v36, %v253_v35 }
  0xfe   :  { %v215_v40 = vadd.f32 %v704_v38, %v545_v24  ;;  %v206_v41 = vpop.f32.mrb[5].mxu0 }
  0xff   :  { %v207_v42 = vadd.f32 %v545_v24, %v206_v41  ;;  %v705_v43 = vpop.f32.mrb[6].mxu0  ;;  %730 = vmatprep.mubr.bf16.mxu1 %v269_v39 }
 0x100   :  { %v218_v44 = vadd.f32 %v705_v43, %v545_v24  ;;  %v209_v45 = vpop.f32.mrb[7].mxu0  ;;  %731 = vmatmul.mubr.bf16.vlgmr.msra.gmra.mrb[0].mxu1 %v270_v37  ;;  %v259_v47 = vmax.f32 %v215_v40, 0.0 }
 0x101   :  { %v210_v46 = vadd.f32 %v545_v24, %v209_v45  ;;  %v257_v49 = vmax.f32 %v207_v42, 0.0 }
 0x102   :  { %v260_v48 = vmax.f32 %v218_v44, 0.0 }
 0x103   :  { %v258_v50 = vmax.f32 %v210_v46, 0.0 }
 0x104   :  { %v272_v51 = vpack.c.bf16 %v260_v48, %v259_v47 }
 0x105   :  { %v271_v52 = vpack.c.bf16 %v258_v50, %v257_v49  ;;  %v708_v53 = vpop.f32.mrb[8].mxu0 }
 0x106   :  { %v231_v54 = vadd.f32 %v708_v53, %v545_v24  ;;  %v222_v55 = vpop.f32.mrb[9].mxu0 }
 0x107   :  { %v223_v56 = vadd.f32 %v545_v24, %v222_v55  ;;  %v709_v57 = vpop.f32.mrb[10].mxu0  ;;  %734 = vmatprep.mubr.bf16.mxu1 %v271_v52 }
 0x108   :  { %v234_v58 = vadd.f32 %v709_v57, %v545_v24  ;;  %v225_v59 = vpop.f32.mrb[11].mxu0  ;;  %735 = vmatmul.mubr.bf16.gmra.mrb[4].mxu1 %v272_v51  ;;  %v263_v61 = vmax.f32 %v231_v54, 0.0 }
 0x109   :  { %v226_v60 = vadd.f32 %v545_v24, %v225_v59  ;;  %v261_v63 = vmax.f32 %v223_v56, 0.0 }
 0x10a   :  { %v264_v62 = vmax.f32 %v234_v58, 0.0 }
 0x10b   :  { %v262_v0 = vmax.f32 %v226_v60, 0.0 }
 0x10c   :  { %v274_v1 = vpack.c.bf16 %v264_v62, %v263_v61 }
 0x10d   :  { %v273_v2 = vpack.c.bf16 %v262_v0, %v261_v63  ;;  %v712_v3 = vpop.f32.mrb[12].mxu0 }
 0x10e   :  { %v247_v4 = vadd.f32 %v712_v3, %v545_v24  ;;  %v238_v5 = vpop.f32.mrb[13].mxu0 }
 0x10f   :  { %v239_v6 = vadd.f32 %v545_v24, %v238_v5  ;;  %v713_v7 = vpop.f32.mrb[14].mxu0  ;;  %738 = vmatprep.mubr.bf16.mxu1 %v273_v2 }
 0x110   :  { %v250_v8 = vadd.f32 %v713_v7, %v545_v24  ;;  %v241_v9 = vpop.f32.mrb[15].mxu0  ;;  %739 = vmatmul.mubr.bf16.gmra.mrb[8].mxu1 %v274_v1  ;;  %v267_v11 = vmax.f32 %v247_v4, 0.0 }
 0x111   :  { %v242_v10 = vadd.f32 %v545_v24, %v241_v9  ;;  %v265_v13 = vmax.f32 %v239_v6, 0.0 }
 0x112   :  { %v268_v12 = vmax.f32 %v250_v8, 0.0 }
 0x113   :  { %v266_v14 = vmax.f32 %v242_v10, 0.0 }
 0x114   :  { %v276_v15 = vpack.c.bf16 %v268_v12, %v267_v11 }
 0x115   :  { %v275_v16 = vpack.c.bf16 %v266_v14, %v265_v13 }
 0x117   :  { %742 = vmatprep.mubr.bf16.mxu1 %v275_v16 }
 0x118   :  { %743 = vmatmul.mubr.bf16.gmra.mrb[12].mxu1 %v276_v15 }
 0x1d3   :  { %v732_v18 = vpop.f32.mrb[0].mxu1 }
 0x1d4   :  { %v391_v19 = vadd.f32 %v732_v18, %v562_v17  ;;  %v382_v20 = vpop.f32.mrb[1].mxu1 }
 0x1d5   :  { %v383_v21 = vadd.f32 %v562_v17, %v382_v20  ;;  %v733_v22 = vpop.f32.mrb[2].mxu1 }
 0x1d6   :  { %v394_v23 = vadd.f32 %v733_v22, %v562_v17  ;;  %v385_v25 = vpop.f32.mrb[3].mxu1  ;;  %v447_v26 = vmax.f32 %v391_v19, 0.0 }
 0x1d7   :  { %v386_v24 = vadd.f32 %v562_v17, %v385_v25  ;;  %v445_v28 = vmax.f32 %v383_v21, 0.0 }
 0x1d8   :  { %v448_v27 = vmax.f32 %v394_v23, 0.0 }
 0x1d9   :  { %v446_v29 = vmax.f32 %v386_v24, 0.0 }
 0x1da   :  { %v611_v30 = vpack.c.bf16 %v448_v27, %v447_v26 }
 0x1db   :  { %v606_v31 = vpack.c.bf16 %v446_v29, %v445_v28  ;;  %v736_v32 = vpop.f32.mrb[4].mxu1 }
 0x1dc   :  { %643 = vst [vmem:[%s907_s5 + $0x8] sm:$0xff] %v611_v30   ;;  %v407_v33 = vadd.f32 %v736_v32, %v562_v17  ;;  %v398_v34 = vpop.f32.mrb[5].mxu1 }
 0x1dd   :  { %607 = vst [vmem:[%s907_s5] sm:$0xff] %v606_v31   ;;  %v399_v35 = vadd.f32 %v562_v17, %v398_v34  ;;  %v737_v36 = vpop.f32.mrb[6].mxu1 }
 0x1de   :  { %v410_v37 = vadd.f32 %v737_v36, %v562_v17  ;;  %v401_v38 = vpop.f32.mrb[7].mxu1  ;;  %v451_v40 = vmax.f32 %v407_v33, 0.0 }
 0x1df   :  { %v402_v39 = vadd.f32 %v562_v17, %v401_v38  ;;  %v449_v42 = vmax.f32 %v399_v35, 0.0 }
 0x1e0   :  { %v452_v41 = vmax.f32 %v410_v37, 0.0 }
 0x1e1   :  { %v450_v43 = vmax.f32 %v402_v39, 0.0 }
 0x1e2   :  { %v621_v44 = vpack.c.bf16 %v452_v41, %v451_v40 }
 0x1e3   :  { %v616_v45 = vpack.c.bf16 %v450_v43, %v449_v42  ;;  %v740_v46 = vpop.f32.mrb[8].mxu1 }
 0x1e4   :  { %645 = vst [vmem:[%s907_s5 + $0x18] sm:$0xff] %v621_v44   ;;  %v423_v47 = vadd.f32 %v740_v46, %v562_v17  ;;  %v414_v48 = vpop.f32.mrb[9].mxu1 }
 0x1e5   :  { %644 = vst [vmem:[%s907_s5 + $0x10] sm:$0xff] %v616_v45   ;;  %v415_v49 = vadd.f32 %v562_v17, %v414_v48  ;;  %v741_v50 = vpop.f32.mrb[10].mxu1 }
 0x1e6   :  { %v426_v51 = vadd.f32 %v741_v50, %v562_v17  ;;  %v417_v52 = vpop.f32.mrb[11].mxu1  ;;  %v455_v54 = vmax.f32 %v423_v47, 0.0 }
 0x1e7   :  { %v418_v53 = vadd.f32 %v562_v17, %v417_v52  ;;  %v453_v56 = vmax.f32 %v415_v49, 0.0 }
 0x1e8   :  { %v456_v55 = vmax.f32 %v426_v51, 0.0 }
 0x1e9   :  { %v454_v57 = vmax.f32 %v418_v53, 0.0 }
 0x1ea   :  { %v631_v58 = vpack.c.bf16 %v456_v55, %v455_v54 }
 0x1eb   :  { %v626_v59 = vpack.c.bf16 %v454_v57, %v453_v56  ;;  %v744_v60 = vpop.f32.mrb[12].mxu1 }
 0x1ec   :  { %647 = vst [vmem:[%s907_s5 + $0x28] sm:$0xff] %v631_v58   ;;  %v439_v61 = vadd.f32 %v744_v60, %v562_v17  ;;  %v430_v62 = vpop.f32.mrb[13].mxu1 }
 0x1ed   :  { %646 = vst [vmem:[%s907_s5 + $0x20] sm:$0xff] %v626_v59   ;;  %v431_v63 = vadd.f32 %v562_v17, %v430_v62  ;;  %v745_v0 = vpop.f32.mrb[14].mxu1 }
 0x1ee   :  { %v442_v1 = vadd.f32 %v745_v0, %v562_v17  ;;  %v433_v2 = vpop.f32.mrb[15].mxu1  ;;  %v459_v4 = vmax.f32 %v439_v61, 0.0 }
 0x1ef   :  { %v434_v3 = vadd.f32 %v562_v17, %v433_v2  ;;  %v457_v6 = vmax.f32 %v431_v63, 0.0 }
 0x1f0   :  { %v460_v5 = vmax.f32 %v442_v1, 0.0 }
 0x1f1   :  { %v458_v7 = vmax.f32 %v434_v3, 0.0 }
 0x1f2   :  { %v641_v8 = vpack.c.bf16 %v460_v5, %v459_v4 }
 0x1f3   :  { %v636_v9 = vpack.c.bf16 %v458_v7, %v457_v6 }
 0x1f4   :  { %649 = vst [vmem:[%s907_s5 + $0x38] sm:$0xff] %v641_v8  }
 0x1f5   :  { %648 = vst [vmem:[%s907_s5 + $0x30] sm:$0xff] %v636_v9  }

// kernel: parallel_layer_forward.15
= control target key start
LH: loop header
LB: loop body
LE: loop exit
PB: predicated region body
PF: predicated region fallthrough
CT: control target
= control target key end

     0   :  { %s618_s1 = inlined_call_operand.vmem [shape: bf16[128,128], index: 1, kind: input, shape index: {}]   ;;  %s619_s0 = inlined_call_operand.vmem [shape: bf16[128,128], index: 0, kind: input, shape index: {}]   ;;  %s620_s2 = inlined_call_operand.vmem [shape: f32[1,128], index: 2, kind: input, shape index: {}]   ;;  %s621_s3 = inlined_call_operand.vmem [shape: bf16[128,128], index: 3, kind: output, shape index: {}]  }
   0x1   :  { %v507_v0 = vld [vmem:[%s618_s1] sm:$0xff]   ;;  %v508_v1 = vld [vmem:[%s618_s1 + $0x8] sm:$0xff]   ;;  %v509_v2 = vld [vmem:[%s618_s1 + $0x10] sm:$0xff]  }
   0x2   :  { %459 = vmatprep.subr.bf16.mxu0 %v507_v0  ;;  %491 = vmatprep.subr.bf16.mxu1 %v507_v0  ;;  %v510_v3 = vld [vmem:[%s618_s1 + $0x18] sm:$0xff]   ;;  %v515_v4 = vld [vmem:[%s619_s0] sm:$0xff]   ;;  %v512_v7 = vld [vmem:[%s618_s1 + $0x28] sm:$0xff]  }
   0x3   :  { %460 = vmatpush3.bf16.msra.mxu0 %v507_v0  ;;  %499 = vmatpush3.bf16.msra.mxu1 %v507_v0  ;;  %v516_v5 = vld [vmem:[%s619_s0 + $0x20] sm:$0xff]   ;;  %v513_v8 = vld [vmem:[%s618_s1 + $0x30] sm:$0xff]   ;;  %v514_v9 = vld [vmem:[%s618_s1 + $0x38] sm:$0xff]  }
   0x4   :  { %461 = vmatprep.subr.bf16.mxu0 %v508_v1  ;;  %492 = vmatprep.subr.bf16.mxu1 %v508_v1  ;;  %v511_v6 = vld [vmem:[%s618_s1 + $0x20] sm:$0xff]   ;;  %v517_v10 = vld [vmem:[%s619_s0 + $0x8] sm:$0xff]   ;;  %v519_v12 = vld [vmem:[%s619_s0 + $0x10] sm:$0xff]  }
   0x5   :  { %475 = vmatprep.mubr.bf16.mxu0 %v515_v4  ;;  %483 = vmatprep.mubr.bf16.mxu1 %v516_v5  ;;  %v518_v11 = vld [vmem:[%s619_s0 + $0x28] sm:$0xff]   ;;  %v520_v13 = vld [vmem:[%s619_s0 + $0x30] sm:$0xff]   ;;  %v521_v14 = vld [vmem:[%s619_s0 + $0x18] sm:$0xff]  }
   0x6   :  { %v522_v15 = vld [vmem:[%s619_s0 + $0x38] sm:$0xff]   ;;  %v347_v16 = vld [vmem:[%s620_s2] ss:$0 sm:$0xff] }
   0x7   :  { %462 = vmatpush3.bf16.msra.mxu0 %v508_v1  ;;  %500 = vmatpush3.bf16.msra.mxu1 %v508_v1 }
   0x8   :  { %463 = vmatprep.subr.bf16.mxu0 %v509_v2  ;;  %493 = vmatprep.subr.bf16.mxu1 %v509_v2 }
   0xb   :  { %464 = vmatpush3.bf16.msra.mxu0 %v509_v2  ;;  %501 = vmatpush3.bf16.msra.mxu1 %v509_v2 }
   0xc   :  { %465 = vmatprep.subr.bf16.mxu0 %v510_v3  ;;  %494 = vmatprep.subr.bf16.mxu1 %v510_v3 }
   0xf   :  { %466 = vmatpush3.bf16.msra.mxu0 %v510_v3  ;;  %502 = vmatpush3.bf16.msra.mxu1 %v510_v3 }
  0x10   :  { %467 = vmatprep.subr.bf16.mxu0 %v511_v6  ;;  %495 = vmatprep.subr.bf16.mxu1 %v511_v6 }
  0x13   :  { %468 = vmatpush3.bf16.msra.mxu0 %v511_v6  ;;  %503 = vmatpush3.bf16.msra.mxu1 %v511_v6 }
  0x14   :  { %469 = vmatprep.subr.bf16.mxu0 %v512_v7  ;;  %496 = vmatprep.subr.bf16.mxu1 %v512_v7 }
  0x17   :  { %470 = vmatpush3.bf16.msra.mxu0 %v512_v7  ;;  %504 = vmatpush3.bf16.msra.mxu1 %v512_v7 }
  0x18   :  { %471 = vmatprep.subr.bf16.mxu0 %v513_v8  ;;  %497 = vmatprep.subr.bf16.mxu1 %v513_v8 }
  0x1b   :  { %472 = vmatpush3.bf16.msra.mxu0 %v513_v8  ;;  %505 = vmatpush3.bf16.msra.mxu1 %v513_v8 }
  0x1c   :  { %473 = vmatprep.subr.bf16.mxu0 %v514_v9  ;;  %498 = vmatprep.subr.bf16.mxu1 %v514_v9 }
  0x1f   :  { %474 = vmatpush3.bf16.msra.mxu0 %v514_v9  ;;  %506 = vmatpush3.bf16.msra.mxu1 %v514_v9 }
  0x22   :  { %476 = vmatmul.mubr.bf16.vlgmr.msra.gmra.mrb[0].mxu0 %v517_v10  ;;  %484 = vmatmul.mubr.bf16.vlgmr.msra.gmra.mrb[0].mxu1 %v518_v11 }
  0x23   :  { %479 = vmatprep.mubr.bf16.mxu0 %v519_v12  ;;  %487 = vmatprep.mubr.bf16.mxu1 %v520_v13 }
  0x2a   :  { %480 = vmatmul.mubr.bf16.gmra.mrb[4].mxu0 %v521_v14  ;;  %488 = vmatmul.mubr.bf16.gmra.mrb[4].mxu1 %v522_v15 }
  0xf5   :  { %v477_v17 = vpop.f32.mrb[0].mxu0  ;;  %v485_v18 = vpop.f32.mrb[0].mxu1 }
  0xf6   :  { %v193_v19 = vadd.f32 %v477_v17, %v347_v16  ;;  %v225_v20 = vadd.f32 %v485_v18, %v347_v16  ;;  %v184_v21 = vpop.f32.mrb[1].mxu0  ;;  %v216_v22 = vpop.f32.mrb[1].mxu1 }
  0xf7   :  { %v185_v23 = vadd.f32 %v347_v16, %v184_v21  ;;  %v217_v24 = vadd.f32 %v347_v16, %v216_v22  ;;  %v478_v25 = vpop.f32.mrb[2].mxu0  ;;  %v486_v26 = vpop.f32.mrb[2].mxu1 }
  0xf8   :  { %v196_v27 = vadd.f32 %v478_v25, %v347_v16  ;;  %v228_v28 = vadd.f32 %v486_v26, %v347_v16  ;;  %v187_v29 = vpop.f32.mrb[3].mxu0  ;;  %v219_v30 = vpop.f32.mrb[3].mxu1  ;;  %v249_v33 = vmax.f32 %v193_v19, 0.0  ;;  %v257_v34 = vmax.f32 %v225_v20, 0.0 }
  0xf9   :  { %v188_v31 = vadd.f32 %v347_v16, %v187_v29  ;;  %v220_v32 = vadd.f32 %v347_v16, %v219_v30  ;;  %v247_v37 = vmax.f32 %v185_v23, 0.0  ;;  %v255_v38 = vmax.f32 %v217_v24, 0.0 }
  0xfa   :  { %v250_v35 = vmax.f32 %v196_v27, 0.0  ;;  %v258_v36 = vmax.f32 %v228_v28, 0.0 }
  0xfb   :  { %v248_v39 = vmax.f32 %v188_v31, 0.0  ;;  %v256_v40 = vmax.f32 %v220_v32, 0.0 }
  0xfc   :  { %v404_v41 = vpack.c.bf16 %v250_v35, %v249_v33  ;;  %v424_v42 = vpack.c.bf16 %v258_v36, %v257_v34 }
  0xfd   :  { %v399_v43 = vpack.c.bf16 %v248_v39, %v247_v37  ;;  %v419_v44 = vpack.c.bf16 %v256_v40, %v255_v38  ;;  %v481_v45 = vpop.f32.mrb[4].mxu0  ;;  %v489_v46 = vpop.f32.mrb[4].mxu1 }
  0xfe   :  { %436 = vst [vmem:[%s621_s3 + $0x8] sm:$0xff] %v404_v41   ;;  %440 = vst [vmem:[%s621_s3 + $0x28] sm:$0xff] %v424_v42   ;;  %v209_v47 = vadd.f32 %v481_v45, %v347_v16  ;;  %v241_v48 = vadd.f32 %v489_v46, %v347_v16  ;;  %v200_v49 = vpop.f32.mrb[5].mxu0  ;;  %v232_v50 = vpop.f32.mrb[5].mxu1 }
  0xff   :  { %400 = vst [vmem:[%s621_s3] sm:$0xff] %v399_v43   ;;  %439 = vst [vmem:[%s621_s3 + $0x20] sm:$0xff] %v419_v44   ;;  %v201_v51 = vadd.f32 %v347_v16, %v200_v49  ;;  %v233_v52 = vadd.f32 %v347_v16, %v232_v50  ;;  %v482_v53 = vpop.f32.mrb[6].mxu0  ;;  %v490_v54 = vpop.f32.mrb[6].mxu1 }
 0x100   :  { %v212_v55 = vadd.f32 %v482_v53, %v347_v16  ;;  %v244_v56 = vadd.f32 %v490_v54, %v347_v16  ;;  %v203_v57 = vpop.f32.mrb[7].mxu0  ;;  %v235_v58 = vpop.f32.mrb[7].mxu1  ;;  %v253_v61 = vmax.f32 %v209_v47, 0.0  ;;  %v261_v62 = vmax.f32 %v241_v48, 0.0 }
 0x101   :  { %v204_v59 = vadd.f32 %v347_v16, %v203_v57  ;;  %v236_v60 = vadd.f32 %v347_v16, %v235_v58  ;;  %v251_v1 = vmax.f32 %v201_v51, 0.0  ;;  %v259_v2 = vmax.f32 %v233_v52, 0.0 }
 0x102   :  { %v254_v63 = vmax.f32 %v212_v55, 0.0  ;;  %v262_v0 = vmax.f32 %v244_v56, 0.0 }
 0x103   :  { %v252_v3 = vmax.f32 %v204_v59, 0.0  ;;  %v260_v4 = vmax.f32 %v236_v60, 0.0 }
 0x104   :  { %v414_v5 = vpack.c.bf16 %v254_v63, %v253_v61  ;;  %v434_v6 = vpack.c.bf16 %v262_v0, %v261_v62 }
 0x105   :  { %v409_v7 = vpack.c.bf16 %v252_v3, %v251_v1  ;;  %v429_v8 = vpack.c.bf16 %v260_v4, %v259_v2 }
 0x106   :  { %438 = vst [vmem:[%s621_s3 + $0x18] sm:$0xff] %v414_v5   ;;  %442 = vst [vmem:[%s621_s3 + $0x38] sm:$0xff] %v434_v6  }
 0x107   :  { %437 = vst [vmem:[%s621_s3 + $0x10] sm:$0xff] %v409_v7   ;;  %441 = vst [vmem:[%s621_s3 + $0x30] sm:$0xff] %v429_v8  }

// kernel: parallel_layer_forward.12
= control target key start
LH: loop header
LB: loop body
LE: loop exit
PB: predicated region body
PF: predicated region fallthrough
CT: control target
= control target key end

     0   :  { %s1185_s1 = inlined_call_operand.vmem [shape: bf16[128,128], index: 1, kind: input, shape index: {}]   ;;  %s1186_s2 = inlined_call_operand.vmem [shape: bf16[128,128], index: 2, kind: input, shape index: {}]   ;;  %s1187_s0 = inlined_call_operand.vmem [shape: bf16[128,128], index: 0, kind: input, shape index: {}]   ;;  %s1188_s3 = inlined_call_operand.vmem [shape: bf16[128,128], index: 3, kind: output, shape index: {0}]   ;;  %s1189_s4 = inlined_call_operand.vmem [shape: bf16[128,128], index: 4, kind: output, shape index: {1}]  }
   0x1   :  { %v1016_v0 = vld [vmem:[%s1185_s1] sm:$0xff]   ;;  %v1018_v2 = vld [vmem:[%s1185_s1 + $0x8] sm:$0xff]   ;;  %v1020_v4 = vld [vmem:[%s1185_s1 + $0x10] sm:$0xff]  }
   0x2   :  { %v1017_v1 = vld [vmem:[%s1186_s2] sm:$0xff]   ;;  %952 = vmatprep.subr.bf16.mxu0 %v1016_v0  ;;  %v1019_v3 = vld [vmem:[%s1186_s2 + $0x8] sm:$0xff]   ;;  %v1021_v5 = vld [vmem:[%s1186_s2 + $0x10] sm:$0xff]  }
   0x3   :  { %984 = vmatprep.subr.bf16.mxu1 %v1017_v1  ;;  %953 = vmatpush3.bf16.msra.mxu0 %v1016_v0  ;;  %v1022_v6 = vld [vmem:[%s1185_s1 + $0x18] sm:$0xff]   ;;  %v1024_v8 = vld [vmem:[%s1185_s1 + $0x20] sm:$0xff]   ;;  %v1026_v10 = vld [vmem:[%s1185_s1 + $0x28] sm:$0xff]  }
   0x4   :  { %985 = vmatpush3.bf16.msra.mxu1 %v1017_v1  ;;  %954 = vmatprep.subr.bf16.mxu0 %v1018_v2  ;;  %v1023_v7 = vld [vmem:[%s1186_s2 + $0x18] sm:$0xff]   ;;  %v1025_v9 = vld [vmem:[%s1186_s2 + $0x20] sm:$0xff]   ;;  %v1027_v12 = vld [vmem:[%s1186_s2 + $0x28] sm:$0xff]  }
   0x5   :  { %986 = vmatprep.subr.bf16.mxu1 %v1019_v3  ;;  %v1032_v11 = vld [vmem:[%s1187_s0] sm:$0xff]   ;;  %v1028_v13 = vld [vmem:[%s1185_s1 + $0x30] sm:$0xff]   ;;  %v1030_v15 = vld [vmem:[%s1185_s1 + $0x38] sm:$0xff]  }
   0x6   :  { %968 = vmatprep.mubr.bf16.mxu0 %v1032_v11  ;;  %1000 = vmatprep.mubr.bf16.mxu1 %v1032_v11  ;;  %v1029_v14 = vld [vmem:[%s1186_s2 + $0x30] sm:$0xff]   ;;  %v1031_v16 = vld [vmem:[%s1186_s2 + $0x38] sm:$0xff]   ;;  %v1033_v17 = vld [vmem:[%s1187_s0 + $0x8] sm:$0xff]  }
   0x7   :  { %955 = vmatpush3.bf16.msra.mxu0 %v1018_v2  ;;  %v1034_v18 = vld [vmem:[%s1187_s0 + $0x10] sm:$0xff]   ;;  %v1035_v19 = vld [vmem:[%s1187_s0 + $0x18] sm:$0xff]   ;;  %v1036_v20 = vld [vmem:[%s1187_s0 + $0x20] sm:$0xff]  }
   0x8   :  { %987 = vmatpush3.bf16.msra.mxu1 %v1019_v3  ;;  %956 = vmatprep.subr.bf16.mxu0 %v1020_v4  ;;  %v1037_v21 = vld [vmem:[%s1187_s0 + $0x28] sm:$0xff]   ;;  %v1038_v22 = vld [vmem:[%s1187_s0 + $0x30] sm:$0xff]   ;;  %v1039_v23 = vld [vmem:[%s1187_s0 + $0x38] sm:$0xff]  }
   0x9   :  { %988 = vmatprep.subr.bf16.mxu1 %v1021_v5 }
   0xb   :  { %957 = vmatpush3.bf16.msra.mxu0 %v1020_v4 }
   0xc   :  { %989 = vmatpush3.bf16.msra.mxu1 %v1021_v5  ;;  %958 = vmatprep.subr.bf16.mxu0 %v1022_v6 }
   0xd   :  { %990 = vmatprep.subr.bf16.mxu1 %v1023_v7 }
   0xf   :  { %959 = vmatpush3.bf16.msra.mxu0 %v1022_v6 }
  0x10   :  { %991 = vmatpush3.bf16.msra.mxu1 %v1023_v7  ;;  %960 = vmatprep.subr.bf16.mxu0 %v1024_v8 }
  0x11   :  { %992 = vmatprep.subr.bf16.mxu1 %v1025_v9 }
  0x13   :  { %961 = vmatpush3.bf16.msra.mxu0 %v1024_v8 }
  0x14   :  { %993 = vmatpush3.bf16.msra.mxu1 %v1025_v9  ;;  %962 = vmatprep.subr.bf16.mxu0 %v1026_v10 }
  0x15   :  { %994 = vmatprep.subr.bf16.mxu1 %v1027_v12 }
  0x17   :  { %963 = vmatpush3.bf16.msra.mxu0 %v1026_v10 }
  0x18   :  { %995 = vmatpush3.bf16.msra.mxu1 %v1027_v12  ;;  %964 = vmatprep.subr.bf16.mxu0 %v1028_v13 }
  0x19   :  { %996 = vmatprep.subr.bf16.mxu1 %v1029_v14 }
  0x1b   :  { %965 = vmatpush3.bf16.msra.mxu0 %v1028_v13 }
  0x1c   :  { %997 = vmatpush3.bf16.msra.mxu1 %v1029_v14  ;;  %966 = vmatprep.subr.bf16.mxu0 %v1030_v15 }
  0x1d   :  { %998 = vmatprep.subr.bf16.mxu1 %v1031_v16 }
  0x1f   :  { %967 = vmatpush3.bf16.msra.mxu0 %v1030_v15 }
  0x20   :  { %999 = vmatpush3.bf16.msra.mxu1 %v1031_v16 }
  0x22   :  { %969 = vmatmul.mubr.bf16.vlgmr.msra.gmra.mrb[0].mxu0 %v1033_v17 }
  0x23   :  { %1001 = vmatmul.mubr.bf16.vlgmr.msra.gmra.mrb[0].mxu1 %v1033_v17  ;;  %972 = vmatprep.mubr.bf16.mxu0 %v1034_v18 }
  0x24   :  { %1004 = vmatprep.mubr.bf16.mxu1 %v1034_v18 }
  0x2a   :  { %973 = vmatmul.mubr.bf16.gmra.mrb[4].mxu0 %v1035_v19 }
  0x2b   :  { %1005 = vmatmul.mubr.bf16.gmra.mrb[4].mxu1 %v1035_v19  ;;  %976 = vmatprep.mubr.bf16.mxu0 %v1036_v20 }
  0x2c   :  { %1008 = vmatprep.mubr.bf16.mxu1 %v1036_v20 }
  0x32   :  { %977 = vmatmul.mubr.bf16.gmra.mrb[8].mxu0 %v1037_v21 }
  0x33   :  { %1009 = vmatmul.mubr.bf16.gmra.mrb[8].mxu1 %v1037_v21  ;;  %980 = vmatprep.mubr.bf16.mxu0 %v1038_v22 }
  0x34   :  { %1012 = vmatprep.mubr.bf16.mxu1 %v1038_v22 }
  0x3a   :  { %981 = vmatmul.mubr.bf16.gmra.mrb[12].mxu0 %v1039_v23 }
  0x3b   :  { %1013 = vmatmul.mubr.bf16.gmra.mrb[12].mxu1 %v1039_v23 }
  0xf5   :  { %v970_v24 = vpop.f32.mrb[0].mxu0 }
  0xf6   :  { %v1002_v25 = vpop.f32.mrb[0].mxu1  ;;  %v231_v26 = vpop.f32.mrb[1].mxu0 }
  0xf7   :  { %v440_v27 = vpop.f32.mrb[1].mxu1  ;;  %v971_v28 = vpop.f32.mrb[2].mxu0 }
  0xf8   :  { %v834_v29 = vpack.c.bf16 %v971_v28, %v970_v24  ;;  %v1003_v30 = vpop.f32.mrb[2].mxu1  ;;  %v234_v31 = vpop.f32.mrb[3].mxu0 }
  0xf9   :  { %v874_v32 = vpack.c.bf16 %v1003_v30, %v1002_v25  ;;  %v829_v33 = vpack.c.bf16 %v234_v31, %v231_v26  ;;  %v443_v34 = vpop.f32.mrb[3].mxu1 }
  0xfa   :  { %906 = vst [vmem:[%s1188_s3 + $0x8] sm:$0xff] %v834_v29   ;;  %v869_v35 = vpack.c.bf16 %v443_v34, %v440_v27 }
  0xfb   :  { %913 = vst [vmem:[%s1189_s4 + $0x8] sm:$0xff] %v874_v32   ;;  %830 = vst [vmem:[%s1188_s3] sm:$0xff] %v829_v33  }
  0xfc   :  { %870 = vst [vmem:[%s1189_s4] sm:$0xff] %v869_v35  }
  0xfd   :  { %v974_v36 = vpop.f32.mrb[4].mxu0 }
  0xfe   :  { %v1006_v37 = vpop.f32.mrb[4].mxu1  ;;  %v247_v38 = vpop.f32.mrb[5].mxu0 }
  0xff   :  { %v456_v39 = vpop.f32.mrb[5].mxu1  ;;  %v975_v40 = vpop.f32.mrb[6].mxu0 }
 0x100   :  { %v844_v41 = vpack.c.bf16 %v975_v40, %v974_v36  ;;  %v1007_v42 = vpop.f32.mrb[6].mxu1  ;;  %v250_v43 = vpop.f32.mrb[7].mxu0 }
 0x101   :  { %v884_v44 = vpack.c.bf16 %v1007_v42, %v1006_v37  ;;  %v839_v45 = vpack.c.bf16 %v250_v43, %v247_v38  ;;  %v459_v46 = vpop.f32.mrb[7].mxu1 }
 0x102   :  { %908 = vst [vmem:[%s1188_s3 + $0x18] sm:$0xff] %v844_v41   ;;  %v879_v47 = vpack.c.bf16 %v459_v46, %v456_v39 }
 0x103   :  { %915 = vst [vmem:[%s1189_s4 + $0x18] sm:$0xff] %v884_v44   ;;  %907 = vst [vmem:[%s1188_s3 + $0x10] sm:$0xff] %v839_v45  }
 0x104   :  { %914 = vst [vmem:[%s1189_s4 + $0x10] sm:$0xff] %v879_v47  }
 0x105   :  { %v978_v48 = vpop.f32.mrb[8].mxu0 }
 0x106   :  { %v1010_v49 = vpop.f32.mrb[8].mxu1  ;;  %v263_v50 = vpop.f32.mrb[9].mxu0 }
 0x107   :  { %v472_v51 = vpop.f32.mrb[9].mxu1  ;;  %v979_v52 = vpop.f32.mrb[10].mxu0 }
 0x108   :  { %v854_v53 = vpack.c.bf16 %v979_v52, %v978_v48  ;;  %v1011_v54 = vpop.f32.mrb[10].mxu1  ;;  %v266_v55 = vpop.f32.mrb[11].mxu0 }
 0x109   :  { %v894_v56 = vpack.c.bf16 %v1011_v54, %v1010_v49  ;;  %v849_v57 = vpack.c.bf16 %v266_v55, %v263_v50  ;;  %v475_v58 = vpop.f32.mrb[11].mxu1 }
 0x10a   :  { %910 = vst [vmem:[%s1188_s3 + $0x28] sm:$0xff] %v854_v53   ;;  %v889_v59 = vpack.c.bf16 %v475_v58, %v472_v51 }
 0x10b   :  { %917 = vst [vmem:[%s1189_s4 + $0x28] sm:$0xff] %v894_v56   ;;  %909 = vst [vmem:[%s1188_s3 + $0x20] sm:$0xff] %v849_v57  }
 0x10c   :  { %916 = vst [vmem:[%s1189_s4 + $0x20] sm:$0xff] %v889_v59  }
 0x10d   :  { %v982_v60 = vpop.f32.mrb[12].mxu0 }
 0x10e   :  { %v1014_v61 = vpop.f32.mrb[12].mxu1  ;;  %v279_v62 = vpop.f32.mrb[13].mxu0 }
 0x10f   :  { %v488_v63 = vpop.f32.mrb[13].mxu1  ;;  %v983_v0 = vpop.f32.mrb[14].mxu0 }
 0x110   :  { %v864_v1 = vpack.c.bf16 %v983_v0, %v982_v60  ;;  %v1015_v2 = vpop.f32.mrb[14].mxu1  ;;  %v282_v3 = vpop.f32.mrb[15].mxu0 }
 0x111   :  { %v904_v4 = vpack.c.bf16 %v1015_v2, %v1014_v61  ;;  %v859_v5 = vpack.c.bf16 %v282_v3, %v279_v62  ;;  %v491_v6 = vpop.f32.mrb[15].mxu1 }
 0x112   :  { %912 = vst [vmem:[%s1188_s3 + $0x38] sm:$0xff] %v864_v1   ;;  %v899_v7 = vpack.c.bf16 %v491_v6, %v488_v63 }
 0x113   :  { %919 = vst [vmem:[%s1189_s4 + $0x38] sm:$0xff] %v904_v4   ;;  %911 = vst [vmem:[%s1188_s3 + $0x30] sm:$0xff] %v859_v5  }
 0x114   :  { %918 = vst [vmem:[%s1189_s4 + $0x30] sm:$0xff] %v899_v7  }

// kernel: parallel_layer_forward.17
= control target key start
LH: loop header
LB: loop body
LE: loop exit
PB: predicated region body
PF: predicated region fallthrough
CT: control target
= control target key end

     0   :  { %s1992_s4 = inlined_call_operand.vmem [shape: bf16[512,128], index: 4, kind: input, shape index: {}]   ;;  %s1993_s0 = inlined_call_operand.vmem [shape: bf16[128,128], index: 0, kind: input, shape index: {}]   ;;  %s1994_s2 = inlined_call_operand.vmem [shape: bf16[128,128], index: 2, kind: input, shape index: {}]   ;;  %s1995_s1 = inlined_call_operand.vmem [shape: bf16[128,128], index: 1, kind: input, shape index: {}]   ;;  %s1996_s3 = inlined_call_operand.vmem [shape: bf16[128,128], index: 3, kind: input, shape index: {}]   ;;  %s1997_s6 = inlined_call_operand.vmem [shape: bf16[128,128], index: 6, kind: input, shape index: {}]   ;;  %s1998_s5 = inlined_call_operand.vmem [shape: f32[1,128], index: 5, kind: input, shape index: {}]   ;;  %s1999_s7 = inlined_call_operand.vmem [shape: f32[1,128], index: 7, kind: input, shape index: {}]   ;;  %s2000_s8 = inlined_call_operand.vmem [shape: f32[128,128], index: 8, kind: output, shape index: {}]  }
   0x1   :  { %v1575_v0 = vld [vmem:[%s1992_s4] sm:$0xff]   ;;  %v1576_v1 = vld [vmem:[%s1992_s4 + $0x8] sm:$0xff]   ;;  %v1577_v2 = vld [vmem:[%s1992_s4 + $0x10] sm:$0xff]  }
   0x2   :  { %1399 = vmatprep.subr.bf16.mxu0 %v1575_v0  ;;  %v1578_v3 = vld [vmem:[%s1992_s4 + $0x18] sm:$0xff]   ;;  %v1583_v4 = vld [vmem:[%s1993_s0] sm:$0xff]   ;;  %v1580_v6 = vld [vmem:[%s1992_s4 + $0x28] sm:$0xff]  }
   0x3   :  { %1400 = vmatpush3.bf16.msra.mxu0 %v1575_v0  ;;  %1415 = vmatprep.mubr.bf16.mxu0 %v1583_v4  ;;  %v1579_v5 = vld [vmem:[%s1992_s4 + $0x20] sm:$0xff]   ;;  %v1581_v7 = vld [vmem:[%s1992_s4 + $0x30] sm:$0xff]   ;;  %v1582_v8 = vld [vmem:[%s1992_s4 + $0x38] sm:$0xff]  }
   0x4   :  { %1401 = vmatprep.subr.bf16.mxu0 %v1576_v1  ;;  %v1599_v9 = vld [vmem:[%s1992_s4 + $0x40] sm:$0xff]   ;;  %v1603_v11 = vld [vmem:[%s1992_s4 + $0x48] sm:$0xff]   ;;  %v1605_v13 = vld [vmem:[%s1992_s4 + $0x50] sm:$0xff]  }
   0x5   :  { %1367 = vmatprep.subr.bf16.mxu1 %v1599_v9  ;;  %v1585_v10 = vld [vmem:[%s1992_s4 + $0x80] sm:$0xff]   ;;  %v1584_v12 = vld [vmem:[%s1993_s0 + $0x8] sm:$0xff]   ;;  %v1587_v14 = vld [vmem:[%s1993_s0 + $0x10] sm:$0xff]  }
   0x6   :  { %1368 = vmatpush3.bf16.msra.mxu1 %v1599_v9  ;;  %v1586_v15 = vld [vmem:[%s1992_s4 + $0x88] sm:$0xff]   ;;  %v1609_v16 = vld [vmem:[%s1992_s4 + $0x58] sm:$0xff]   ;;  %v1589_v17 = vld [vmem:[%s1992_s4 + $0x90] sm:$0xff]  }
   0x7   :  { %1402 = vmatpush3.bf16.msra.mxu0 %v1576_v1  ;;  %1369 = vmatprep.subr.bf16.mxu1 %v1603_v11  ;;  %v1611_v18 = vld [vmem:[%s1992_s4 + $0x60] sm:$0xff]   ;;  %v1588_v19 = vld [vmem:[%s1993_s0 + $0x18] sm:$0xff]   ;;  %v1615_v22 = vld [vmem:[%s1992_s4 + $0x68] sm:$0xff]  }
   0x8   :  { %1403 = vmatprep.subr.bf16.mxu0 %v1577_v2  ;;  %v1591_v20 = vld [vmem:[%s1993_s0 + $0x20] sm:$0xff]   ;;  %v1590_v21 = vld [vmem:[%s1992_s4 + $0x98] sm:$0xff]   ;;  %v1592_v23 = vld [vmem:[%s1993_s0 + $0x28] sm:$0xff]  }
   0x9   :  { %v1593_v24 = vld [vmem:[%s1992_s4 + $0xa0] sm:$0xff]   ;;  %v1617_v25 = vld [vmem:[%s1992_s4 + $0x70] sm:$0xff]   ;;  %v1594_v26 = vld [vmem:[%s1992_s4 + $0xa8] sm:$0xff]  }
   0xa   :  { %1370 = vmatpush3.bf16.msra.mxu1 %v1603_v11  ;;  %v1595_v27 = vld [vmem:[%s1993_s0 + $0x30] sm:$0xff]   ;;  %v1623_v28 = vld [vmem:[%s1995_s1] sm:$0xff]   ;;  %v1621_v29 = vld [vmem:[%s1992_s4 + $0x78] sm:$0xff]  }
   0xb   :  { %1404 = vmatpush3.bf16.msra.mxu0 %v1577_v2  ;;  %1371 = vmatprep.subr.bf16.mxu1 %v1605_v13  ;;  %v1597_v30 = vld [vmem:[%s1992_s4 + $0xb0] sm:$0xff]   ;;  %v1596_v31 = vld [vmem:[%s1993_s0 + $0x38] sm:$0xff]   ;;  %v1600_v33 = vld [vmem:[%s1994_s2] sm:$0xff]  }
   0xc   :  { %1405 = vmatprep.subr.bf16.mxu0 %v1578_v3  ;;  %1383 = vmatprep.mubr.bf16.mxu1 %v1623_v28  ;;  %v1598_v32 = vld [vmem:[%s1992_s4 + $0xb8] sm:$0xff]   ;;  %v1624_v34 = vld [vmem:[%s1995_s1 + $0x8] sm:$0xff]   ;;  %v1627_v35 = vld [vmem:[%s1995_s1 + $0x10] sm:$0xff]  }
   0xd   :  { %v1602_v36 = vld [vmem:[%s1992_s4 + $0xc0] sm:$0xff]   ;;  %v1601_v37 = vld [vmem:[%s1994_s2 + $0x8] sm:$0xff]   ;;  %v1606_v39 = vld [vmem:[%s1994_s2 + $0x10] sm:$0xff]  }
   0xe   :  { %1372 = vmatpush3.bf16.msra.mxu1 %v1605_v13  ;;  %v1604_v38 = vld [vmem:[%s1992_s4 + $0xc8] sm:$0xff]   ;;  %v1628_v40 = vld [vmem:[%s1995_s1 + $0x18] sm:$0xff]   ;;  %v1639_v41 = vld [vmem:[%s1997_s6] sm:$0xff]  }
   0xf   :  { %1406 = vmatpush3.bf16.msra.mxu0 %v1578_v3  ;;  %1373 = vmatprep.subr.bf16.mxu1 %v1609_v16  ;;  %v1631_v42 = vld [vmem:[%s1995_s1 + $0x20] sm:$0xff]   ;;  %v1640_v43 = vld [vmem:[%s1997_s6 + $0x8] sm:$0xff]   ;;  %v1608_v44 = vld [vmem:[%s1992_s4 + $0xd0] sm:$0xff]  }
  0x10   :  { %1407 = vmatprep.subr.bf16.mxu0 %v1579_v5  ;;  %v1607_v45 = vld [vmem:[%s1994_s2 + $0x18] sm:$0xff]   ;;  %v1641_v46 = vld [vmem:[%s1997_s6 + $0x10] sm:$0xff]   ;;  %v1612_v47 = vld [vmem:[%s1994_s2 + $0x20] sm:$0xff]  }
  0x11   :  { %v1610_v48 = vld [vmem:[%s1992_s4 + $0xd8] sm:$0xff]   ;;  %v1632_v49 = vld [vmem:[%s1995_s1 + $0x28] sm:$0xff]   ;;  %v1635_v50 = vld [vmem:[%s1995_s1 + $0x30] sm:$0xff]  }
  0x12   :  { %1374 = vmatpush3.bf16.msra.mxu1 %v1609_v16  ;;  %v1642_v51 = vld [vmem:[%s1997_s6 + $0x18] sm:$0xff]   ;;  %v1614_v52 = vld [vmem:[%s1992_s4 + $0xe0] sm:$0xff]   ;;  %v1613_v53 = vld [vmem:[%s1994_s2 + $0x28] sm:$0xff]  }
  0x13   :  { %1408 = vmatpush3.bf16.msra.mxu0 %v1579_v5  ;;  %1375 = vmatprep.subr.bf16.mxu1 %v1611_v18  ;;  %v1643_v54 = vld [vmem:[%s1997_s6 + $0x20] sm:$0xff]   ;;  %v1618_v55 = vld [vmem:[%s1994_s2 + $0x30] sm:$0xff]   ;;  %v1616_v56 = vld [vmem:[%s1992_s4 + $0xe8] sm:$0xff]  }
  0x14   :  { %1409 = vmatprep.subr.bf16.mxu0 %v1580_v6  ;;  %v1636_v57 = vld [vmem:[%s1995_s1 + $0x38] sm:$0xff]   ;;  %v1620_v58 = vld [vmem:[%s1992_s4 + $0xf0] sm:$0xff]   ;;  %v1625_v60 = vld [vmem:[%s1996_s3] sm:$0xff]  }
  0x15   :  { %v1619_v59 = vld [vmem:[%s1994_s2 + $0x38] sm:$0xff]   ;;  %v1626_v62 = vld [vmem:[%s1996_s3 + $0x8] sm:$0xff]   ;;  %v1629_v63 = vld [vmem:[%s1996_s3 + $0x10] sm:$0xff]  }
  0x16   :  { %1376 = vmatpush3.bf16.msra.mxu1 %v1611_v18  ;;  %v1622_v61 = vld [vmem:[%s1992_s4 + $0xf8] sm:$0xff]   ;;  %v1633_v1 = vld [vmem:[%s1996_s3 + $0x20] sm:$0xff]   ;;  %v1634_v2 = vld [vmem:[%s1996_s3 + $0x28] sm:$0xff]  }
  0x17   :  { %1410 = vmatpush3.bf16.msra.mxu0 %v1580_v6  ;;  %1377 = vmatprep.subr.bf16.mxu1 %v1615_v22  ;;  %v1630_v0 = vld [vmem:[%s1996_s3 + $0x18] sm:$0xff]   ;;  %v1637_v3 = vld [vmem:[%s1996_s3 + $0x30] sm:$0xff]   ;;  %v1644_v5 = vld [vmem:[%s1997_s6 + $0x28] sm:$0xff]  }
  0x18   :  { %1411 = vmatprep.subr.bf16.mxu0 %v1581_v7  ;;  %v1638_v4 = vld [vmem:[%s1996_s3 + $0x38] sm:$0xff]   ;;  %v1645_v6 = vld [vmem:[%s1997_s6 + $0x30] sm:$0xff]  }
  0x1a   :  { %1378 = vmatpush3.bf16.msra.mxu1 %v1615_v22 }
  0x1b   :  { %1412 = vmatpush3.bf16.msra.mxu0 %v1581_v7  ;;  %1379 = vmatprep.subr.bf16.mxu1 %v1617_v25  ;;  %v1646_v7 = vld [vmem:[%s1997_s6 + $0x38] sm:$0xff]  }
  0x1c   :  { %1413 = vmatprep.subr.bf16.mxu0 %v1582_v8 }
  0x1e   :  { %1380 = vmatpush3.bf16.msra.mxu1 %v1617_v25  ;;  %v1919_v25 = vld [vmem:[%s1998_s5] ss:$0 sm:$0xff] }
  0x1f   :  { %1414 = vmatpush3.bf16.msra.mxu0 %v1582_v8  ;;  %1381 = vmatprep.subr.bf16.mxu1 %v1621_v29 }
  0x20   :  { %1431 = vmatprep.subr.bf16.mxu0 %v1585_v10 }
  0x22   :  { %1416 = vmatmul.mubr.bf16.vlgmr.msra.gmra.mrb[0].mxu0 %v1584_v12  ;;  %1382 = vmatpush3.bf16.msra.mxu1 %v1621_v29 }
  0x23   :  { %1432 = vmatpush3.bf16.msra.mxu0 %v1585_v10  ;;  %1419 = vmatprep.mubr.bf16.mxu0 %v1587_v14 }
  0x24   :  { %1433 = vmatprep.subr.bf16.mxu0 %v1586_v15  ;;  %1495 = vmatprep.subr.bf16.mxu1 %v1639_v41 }
  0x25   :  { %1384 = vmatmul.mubr.bf16.vlgmr.msra.gmra.mrb[0].mxu1 %v1624_v34 }
  0x26   :  { %1387 = vmatprep.mubr.bf16.mxu1 %v1627_v35  ;;  %1496 = vmatpush3.bf16.msra.mxu1 %v1639_v41 }
  0x27   :  { %1434 = vmatpush3.bf16.msra.mxu0 %v1586_v15  ;;  %1497 = vmatprep.subr.bf16.mxu1 %v1640_v43 }
  0x28   :  { %1435 = vmatprep.subr.bf16.mxu0 %v1589_v17 }
  0x2a   :  { %1420 = vmatmul.mubr.bf16.gmra.mrb[4].mxu0 %v1588_v19  ;;  %1498 = vmatpush3.bf16.msra.mxu1 %v1640_v43 }
  0x2b   :  { %1436 = vmatpush3.bf16.msra.mxu0 %v1589_v17  ;;  %1423 = vmatprep.mubr.bf16.mxu0 %v1591_v20 }
  0x2c   :  { %1437 = vmatprep.subr.bf16.mxu0 %v1590_v21  ;;  %1499 = vmatprep.subr.bf16.mxu1 %v1641_v46 }
  0x2d   :  { %1388 = vmatmul.mubr.bf16.gmra.mrb[4].mxu1 %v1628_v40 }
  0x2e   :  { %1391 = vmatprep.mubr.bf16.mxu1 %v1631_v42  ;;  %1500 = vmatpush3.bf16.msra.mxu1 %v1641_v46 }
  0x2f   :  { %1438 = vmatpush3.bf16.msra.mxu0 %v1590_v21  ;;  %1501 = vmatprep.subr.bf16.mxu1 %v1642_v51 }
  0x30   :  { %1439 = vmatprep.subr.bf16.mxu0 %v1593_v24 }
  0x32   :  { %1424 = vmatmul.mubr.bf16.gmra.mrb[8].mxu0 %v1592_v23  ;;  %1502 = vmatpush3.bf16.msra.mxu1 %v1642_v51 }
  0x33   :  { %1440 = vmatpush3.bf16.msra.mxu0 %v1593_v24  ;;  %1427 = vmatprep.mubr.bf16.mxu0 %v1595_v27 }
  0x34   :  { %1441 = vmatprep.subr.bf16.mxu0 %v1594_v26  ;;  %1503 = vmatprep.subr.bf16.mxu1 %v1643_v54 }
  0x35   :  { %1392 = vmatmul.mubr.bf16.gmra.mrb[8].mxu1 %v1632_v49 }
  0x36   :  { %1395 = vmatprep.mubr.bf16.mxu1 %v1635_v50  ;;  %1504 = vmatpush3.bf16.msra.mxu1 %v1643_v54 }
  0x37   :  { %1442 = vmatpush3.bf16.msra.mxu0 %v1594_v26  ;;  %1505 = vmatprep.subr.bf16.mxu1 %v1644_v5 }
  0x38   :  { %1443 = vmatprep.subr.bf16.mxu0 %v1597_v30 }
  0x3a   :  { %1428 = vmatmul.mubr.bf16.gmra.mrb[12].mxu0 %v1596_v31  ;;  %1506 = vmatpush3.bf16.msra.mxu1 %v1644_v5 }
  0x3b   :  { %1444 = vmatpush3.bf16.msra.mxu0 %v1597_v30  ;;  %1447 = vmatprep.mubr.bf16.mxu0 %v1600_v33 }
  0x3c   :  { %1445 = vmatprep.subr.bf16.mxu0 %v1598_v32  ;;  %1507 = vmatprep.subr.bf16.mxu1 %v1645_v6 }
  0x3d   :  { %1396 = vmatmul.mubr.bf16.gmra.mrb[12].mxu1 %v1636_v57 }
  0x3e   :  { %1508 = vmatpush3.bf16.msra.mxu1 %v1645_v6 }
  0x3f   :  { %1446 = vmatpush3.bf16.msra.mxu0 %v1598_v32  ;;  %1509 = vmatprep.subr.bf16.mxu1 %v1646_v7 }
  0x40   :  { %1463 = vmatprep.subr.bf16.mxu0 %v1602_v36 }
  0x42   :  { %1448 = vmatmul.mubr.bf16.vlgmr.msra.gmra.mrb[0].mxu0 %v1601_v37  ;;  %1510 = vmatpush3.bf16.msra.mxu1 %v1646_v7 }
  0x43   :  { %1464 = vmatpush3.bf16.msra.mxu0 %v1602_v36  ;;  %1451 = vmatprep.mubr.bf16.mxu0 %v1606_v39 }
  0x44   :  { %1465 = vmatprep.subr.bf16.mxu0 %v1604_v38 }
  0x47   :  { %1466 = vmatpush3.bf16.msra.mxu0 %v1604_v38 }
  0x48   :  { %1467 = vmatprep.subr.bf16.mxu0 %v1608_v44 }
  0x4a   :  { %1452 = vmatmul.mubr.bf16.gmra.mrb[4].mxu0 %v1607_v45 }
  0x4b   :  { %1468 = vmatpush3.bf16.msra.mxu0 %v1608_v44  ;;  %1455 = vmatprep.mubr.bf16.mxu0 %v1612_v47 }
  0x4c   :  { %1469 = vmatprep.subr.bf16.mxu0 %v1610_v48 }
  0x4f   :  { %1470 = vmatpush3.bf16.msra.mxu0 %v1610_v48 }
  0x50   :  { %1471 = vmatprep.subr.bf16.mxu0 %v1614_v52 }
  0x52   :  { %1456 = vmatmul.mubr.bf16.gmra.mrb[8].mxu0 %v1613_v53 }
  0x53   :  { %1472 = vmatpush3.bf16.msra.mxu0 %v1614_v52  ;;  %1459 = vmatprep.mubr.bf16.mxu0 %v1618_v55 }
  0x54   :  { %1473 = vmatprep.subr.bf16.mxu0 %v1616_v56 }
  0x57   :  { %1474 = vmatpush3.bf16.msra.mxu0 %v1616_v56 }
  0x58   :  { %1475 = vmatprep.subr.bf16.mxu0 %v1620_v58 }
  0x5a   :  { %1460 = vmatmul.mubr.bf16.gmra.mrb[12].mxu0 %v1619_v59 }
  0x5b   :  { %1476 = vmatpush3.bf16.msra.mxu0 %v1620_v58  ;;  %1479 = vmatprep.mubr.bf16.mxu0 %v1625_v60 }
  0x5c   :  { %1477 = vmatprep.subr.bf16.mxu0 %v1622_v61 }
  0x5f   :  { %1478 = vmatpush3.bf16.msra.mxu0 %v1622_v61 }
  0x62   :  { %1480 = vmatmul.mubr.bf16.vlgmr.msra.gmra.mrb[0].mxu0 %v1626_v62 }
  0x63   :  { %1483 = vmatprep.mubr.bf16.mxu0 %v1629_v63 }
  0x6a   :  { %1484 = vmatmul.mubr.bf16.gmra.mrb[4].mxu0 %v1630_v0 }
  0x6b   :  { %1487 = vmatprep.mubr.bf16.mxu0 %v1633_v1 }
  0x72   :  { %1488 = vmatmul.mubr.bf16.gmra.mrb[8].mxu0 %v1634_v2 }
  0x73   :  { %1491 = vmatprep.mubr.bf16.mxu0 %v1637_v3 }
  0x7a   :  { %1492 = vmatmul.mubr.bf16.gmra.mrb[12].mxu0 %v1638_v4 }
  0xf8   :  { %v1385_v8 = vpop.f32.mrb[0].mxu1 }
  0xf9   :  { %v224_v9 = vpop.f32.mrb[1].mxu1 }
  0xfa   :  { %v1386_v10 = vpop.f32.mrb[2].mxu1 }
  0xfb   :  { %v227_v11 = vpop.f32.mrb[3].mxu1 }
 0x100   :  { %v1389_v12 = vpop.f32.mrb[4].mxu1 }
 0x101   :  { %v240_v13 = vpop.f32.mrb[5].mxu1 }
 0x102   :  { %v1390_v14 = vpop.f32.mrb[6].mxu1 }
 0x103   :  { %v243_v15 = vpop.f32.mrb[7].mxu1 }
 0x108   :  { %v1393_v16 = vpop.f32.mrb[8].mxu1 }
 0x109   :  { %v256_v17 = vpop.f32.mrb[9].mxu1 }
 0x10a   :  { %v1394_v18 = vpop.f32.mrb[10].mxu1 }
 0x10b   :  { %v259_v19 = vpop.f32.mrb[11].mxu1 }
 0x110   :  { %v1908_v20 = vpop.f32.mrb[12].mxu1 }
 0x111   :  { %v1910_v21 = vpop.f32.mrb[13].mxu1 }
 0x112   :  { %v1912_v22 = vpop.f32.mrb[14].mxu1 }
 0x113   :  { %v1914_v23 = vpop.f32.mrb[15].mxu1 }
 0x135   :  { %v1481_v24 = vpop.f32.mrb[0].mxu0 }
 0x136   :  { %v1527_v26 = vadd.f32 %v1481_v24, %v1385_v8  ;;  %v883_v27 = vpop.f32.mrb[1].mxu0 }
 0x137   :  { %v1528_v28 = vadd.f32 %v883_v27, %v224_v9  ;;  %v1482_v29 = vpop.f32.mrb[2].mxu0 }
 0x138   :  { %v971_v30 = vadd.f32 %v1527_v26, %v1919_v25  ;;  %v1529_v31 = vadd.f32 %v1482_v29, %v1386_v10  ;;  %v886_v32 = vpop.f32.mrb[3].mxu0 }
 0x139   :  { %v969_v33 = vadd.f32 %v1528_v28, %v1919_v25  ;;  %v1530_v34 = vadd.f32 %v886_v32, %v227_v11 }
 0x13a   :  { %v972_v35 = vadd.f32 %v1529_v31, %v1919_v25  ;;  %v987_v37 = vmax.f32 %v971_v30, 0.0 }
 0x13b   :  { %v970_v36 = vadd.f32 %v1530_v34, %v1919_v25  ;;  %v985_v39 = vmax.f32 %v969_v33, 0.0 }
 0x13c   :  { %v988_v38 = vmax.f32 %v972_v35, 0.0 }
 0x13d   :  { %v986_v40 = vmax.f32 %v970_v36, 0.0  ;;  %v1485_v41 = vpop.f32.mrb[4].mxu0 }
 0x13e   :  { %v1002_v42 = vpack.c.bf16 %v988_v38, %v987_v37  ;;  %v1531_v43 = vadd.f32 %v1485_v41, %v1389_v12  ;;  %v899_v44 = vpop.f32.mrb[5].mxu0 }
 0x13f   :  { %v1532_v45 = vadd.f32 %v899_v44, %v240_v13  ;;  %v1486_v46 = vpop.f32.mrb[6].mxu0  ;;  %v1001_v47 = vpack.c.bf16 %v986_v40, %v985_v39 }
 0x140   :  { %v975_v48 = vadd.f32 %v1531_v43, %v1919_v25  ;;  %v1533_v49 = vadd.f32 %v1486_v46, %v1390_v14  ;;  %v902_v50 = vpop.f32.mrb[7].mxu0 }
 0x141   :  { %v973_v51 = vadd.f32 %v1532_v45, %v1919_v25  ;;  %v1534_v52 = vadd.f32 %v902_v50, %v243_v15  ;;  %1511 = vmatprep.mubr.bf16.mxu1 %v1001_v47 }
 0x142   :  { %v976_v53 = vadd.f32 %v1533_v49, %v1919_v25  ;;  %1512 = vmatmul.mubr.bf16.vlgmr.msra.gmra.mrb[16].mxu1 %v1002_v42  ;;  %v991_v55 = vmax.f32 %v975_v48, 0.0 }
 0x143   :  { %v974_v54 = vadd.f32 %v1534_v52, %v1919_v25  ;;  %v989_v57 = vmax.f32 %v973_v51, 0.0 }
 0x144   :  { %v992_v56 = vmax.f32 %v976_v53, 0.0 }
 0x145   :  { %v990_v58 = vmax.f32 %v974_v54, 0.0  ;;  %v1489_v59 = vpop.f32.mrb[8].mxu0 }
 0x146   :  { %v1535_v60 = vadd.f32 %v1489_v59, %v1393_v16  ;;  %v915_v61 = vpop.f32.mrb[9].mxu0  ;;  %v1004_v62 = vpack.c.bf16 %v992_v56, %v991_v55 }
 0x147   :  { %v1536_v63 = vadd.f32 %v915_v61, %v256_v17  ;;  %v1490_v0 = vpop.f32.mrb[10].mxu0  ;;  %v1003_v1 = vpack.c.bf16 %v990_v58, %v989_v57 }
 0x148   :  { %v979_v2 = vadd.f32 %v1535_v60, %v1919_v25  ;;  %v1537_v3 = vadd.f32 %v1490_v0, %v1394_v18  ;;  %v918_v4 = vpop.f32.mrb[11].mxu0 }
 0x149   :  { %v977_v5 = vadd.f32 %v1536_v63, %v1919_v25  ;;  %v1538_v6 = vadd.f32 %v918_v4, %v259_v19  ;;  %1515 = vmatprep.mubr.bf16.mxu1 %v1003_v1 }
 0x14a   :  { %v980_v7 = vadd.f32 %v1537_v3, %v1919_v25  ;;  %1516 = vmatmul.mubr.bf16.gmra.mrb[20].mxu1 %v1004_v62  ;;  %v995_v9 = vmax.f32 %v979_v2, 0.0 }
 0x14b   :  { %v978_v8 = vadd.f32 %v1538_v6, %v1919_v25  ;;  %v993_v11 = vmax.f32 %v977_v5, 0.0 }
 0x14c   :  { %v996_v10 = vmax.f32 %v980_v7, 0.0 }
 0x14d   :  { %v994_v12 = vmax.f32 %v978_v8, 0.0  ;;  %v1493_v13 = vpop.f32.mrb[12].mxu0 }
 0x14e   :  { %v1539_v14 = vadd.f32 %v1493_v13, %v1908_v20  ;;  %v931_v15 = vpop.f32.mrb[13].mxu0  ;;  %v1006_v16 = vpack.c.bf16 %v996_v10, %v995_v9 }
 0x14f   :  { %v1540_v17 = vadd.f32 %v931_v15, %v1910_v21  ;;  %v1494_v18 = vpop.f32.mrb[14].mxu0  ;;  %v1005_v24 = vpack.c.bf16 %v994_v12, %v993_v11 }
 0x150   :  { %v983_v19 = vadd.f32 %v1539_v14, %v1919_v25  ;;  %v1541_v26 = vadd.f32 %v1494_v18, %v1912_v22  ;;  %v934_v27 = vpop.f32.mrb[15].mxu0  ;;  %v1278_v22 = vld [vmem:[%s1999_s7] ss:$0 sm:$0xff] }
 0x151   :  { %v981_v28 = vadd.f32 %v1540_v17, %v1919_v25  ;;  %v1542_v29 = vadd.f32 %v934_v27, %v1914_v23  ;;  %1519 = vmatprep.mubr.bf16.mxu1 %v1005_v24 }
 0x152   :  { %v984_v30 = vadd.f32 %v1541_v26, %v1919_v25  ;;  %1520 = vmatmul.mubr.bf16.gmra.mrb[24].mxu1 %v1006_v16  ;;  %v999_v31 = vmax.f32 %v983_v19, 0.0 }
 0x153   :  { %v982_v20 = vadd.f32 %v1542_v29, %v1919_v25  ;;  %v997_v21 = vmax.f32 %v981_v28, 0.0 }
 0x154   :  { %v1000_v32 = vmax.f32 %v984_v30, 0.0 }
 0x155   :  { %v998_v33 = vmax.f32 %v982_v20, 0.0 }
 0x156   :  { %v1008_v34 = vpack.c.bf16 %v1000_v32, %v999_v31 }
 0x157   :  { %v1007_v35 = vpack.c.bf16 %v998_v33, %v997_v21 }
 0x159   :  { %1523 = vmatprep.mubr.bf16.mxu1 %v1007_v35 }
 0x15a   :  { %1524 = vmatmul.mubr.bf16.gmra.mrb[28].mxu1 %v1008_v34 }
 0x215   :  { %v1513_v36 = vpop.f32.mrb[16].mxu1 }
 0x216   :  { %v1123_v23 = vadd.f32 %v1513_v36, %v1278_v22  ;;  %v1114_v37 = vpop.f32.mrb[17].mxu1 }
 0x217   :  { %v1115_v38 = vadd.f32 %v1278_v22, %v1114_v37  ;;  %v1514_v39 = vpop.f32.mrb[18].mxu1 }
 0x218   :  { %v1179_v40 = vmax.f32 %v1123_v23, 0.0  ;;  %v1126_v41 = vadd.f32 %v1514_v39, %v1278_v22  ;;  %v1117_v25 = vpop.f32.mrb[19].mxu1 }
 0x219   :  { %v1177_v42 = vmax.f32 %v1115_v38, 0.0  ;;  %v1118_v43 = vadd.f32 %v1278_v22, %v1117_v25 }
 0x21a   :  { %1195 = vst [vmem:[%s2000_s8 + $0x10] sm:$0xff] %v1179_v40  ;;  %v1180_v44 = vmax.f32 %v1126_v41, 0.0 }
 0x21b   :  { %1193 = vst [vmem:[%s2000_s8] sm:$0xff] %v1177_v42  ;;  %v1178_v45 = vmax.f32 %v1118_v43, 0.0 }
 0x21c   :  { %1196 = vst [vmem:[%s2000_s8 + $0x18] sm:$0xff] %v1180_v44 }
 0x21d   :  { %1194 = vst [vmem:[%s2000_s8 + $0x8] sm:$0xff] %v1178_v45  ;;  %v1517_v46 = vpop.f32.mrb[20].mxu1 }
 0x21e   :  { %v1139_v47 = vadd.f32 %v1517_v46, %v1278_v22  ;;  %v1130_v48 = vpop.f32.mrb[21].mxu1 }
 0x21f   :  { %v1131_v49 = vadd.f32 %v1278_v22, %v1130_v48  ;;  %v1518_v50 = vpop.f32.mrb[22].mxu1 }
 0x220   :  { %v1183_v51 = vmax.f32 %v1139_v47, 0.0  ;;  %v1142_v52 = vadd.f32 %v1518_v50, %v1278_v22  ;;  %v1133_v53 = vpop.f32.mrb[23].mxu1 }
 0x221   :  { %v1181_v54 = vmax.f32 %v1131_v49, 0.0  ;;  %v1134_v55 = vadd.f32 %v1278_v22, %v1133_v53 }
 0x222   :  { %1199 = vst [vmem:[%s2000_s8 + $0x30] sm:$0xff] %v1183_v51  ;;  %v1184_v56 = vmax.f32 %v1142_v52, 0.0 }
 0x223   :  { %1197 = vst [vmem:[%s2000_s8 + $0x20] sm:$0xff] %v1181_v54  ;;  %v1182_v57 = vmax.f32 %v1134_v55, 0.0 }
 0x224   :  { %1200 = vst [vmem:[%s2000_s8 + $0x38] sm:$0xff] %v1184_v56 }
 0x225   :  { %1198 = vst [vmem:[%s2000_s8 + $0x28] sm:$0xff] %v1182_v57  ;;  %v1521_v58 = vpop.f32.mrb[24].mxu1 }
 0x226   :  { %v1155_v59 = vadd.f32 %v1521_v58, %v1278_v22  ;;  %v1146_v60 = vpop.f32.mrb[25].mxu1 }
 0x227   :  { %v1147_v61 = vadd.f32 %v1278_v22, %v1146_v60  ;;  %v1522_v62 = vpop.f32.mrb[26].mxu1 }
 0x228   :  { %v1187_v63 = vmax.f32 %v1155_v59, 0.0  ;;  %v1158_v0 = vadd.f32 %v1522_v62, %v1278_v22  ;;  %v1149_v1 = vpop.f32.mrb[27].mxu1 }
 0x229   :  { %v1185_v2 = vmax.f32 %v1147_v61, 0.0  ;;  %v1150_v3 = vadd.f32 %v1278_v22, %v1149_v1 }
 0x22a   :  { %1203 = vst [vmem:[%s2000_s8 + $0x50] sm:$0xff] %v1187_v63  ;;  %v1188_v4 = vmax.f32 %v1158_v0, 0.0 }
 0x22b   :  { %1201 = vst [vmem:[%s2000_s8 + $0x40] sm:$0xff] %v1185_v2  ;;  %v1186_v5 = vmax.f32 %v1150_v3, 0.0 }
 0x22c   :  { %1204 = vst [vmem:[%s2000_s8 + $0x58] sm:$0xff] %v1188_v4 }
 0x22d   :  { %1202 = vst [vmem:[%s2000_s8 + $0x48] sm:$0xff] %v1186_v5  ;;  %v1525_v6 = vpop.f32.mrb[28].mxu1 }
 0x22e   :  { %v1171_v7 = vadd.f32 %v1525_v6, %v1278_v22  ;;  %v1162_v8 = vpop.f32.mrb[29].mxu1 }
 0x22f   :  { %v1163_v9 = vadd.f32 %v1278_v22, %v1162_v8  ;;  %v1526_v10 = vpop.f32.mrb[30].mxu1 }
 0x230   :  { %v1191_v11 = vmax.f32 %v1171_v7, 0.0  ;;  %v1174_v12 = vadd.f32 %v1526_v10, %v1278_v22  ;;  %v1165_v13 = vpop.f32.mrb[31].mxu1 }
 0x231   :  { %v1189_v14 = vmax.f32 %v1163_v9, 0.0  ;;  %v1166_v15 = vadd.f32 %v1278_v22, %v1165_v13 }
 0x232   :  { %1207 = vst [vmem:[%s2000_s8 + $0x70] sm:$0xff] %v1191_v11  ;;  %v1192_v16 = vmax.f32 %v1174_v12, 0.0 }
 0x233   :  { %1205 = vst [vmem:[%s2000_s8 + $0x60] sm:$0xff] %v1189_v14  ;;  %v1190_v17 = vmax.f32 %v1166_v15, 0.0 }
 0x234   :  { %1208 = vst [vmem:[%s2000_s8 + $0x78] sm:$0xff] %v1192_v16 }
 0x235   :  { %1206 = vst [vmem:[%s2000_s8 + $0x68] sm:$0xff] %v1190_v17 }

</bundles_post_ra>
